<compile_context>
chip_gen: v7x
topology: tpu7x:2x2x1
jax: 0.10.0
libtpu: 0.0.40
codegen_flags: <defaults>
</compile_context>

<pallas_src>
import functools

import jax
import jax.numpy as jnp
from jax import lax
from jax.experimental import pallas as pl
from jax.experimental.pallas import tpu as pltpu


# ---------------------------------------------------------------------------
# VMEM budget (generation aware, with headroom)
# ---------------------------------------------------------------------------
def _vmem_limit_bytes():
    try:
        info = pltpu.get_tpu_info()
        cap = getattr(info, "vmem_capacity_bytes", None)
        if cap:
            return int(cap) * 7 // 10
    except Exception:
        pass
    return 64 * 1024 * 1024


_VMEM_LIMIT = _vmem_limit_bytes()


# ---------------------------------------------------------------------------
# Pallas kernels
# ---------------------------------------------------------------------------
def _conv_kernel(*refs, n_in, k, d, act, emit_stats, tile_rows):
    """Fused implicit-im2col conv + per-channel affine + activation.

    refs layout (inputs then outputs):
      x_0..x_{n_in-1} : (1, He, We, Cin_i) bf16  padded NHWC inputs (one image)
      w_0..w_{n_in-1} : (k*k, Cin_i, Cout) bf16  per-tap weight matrices
      sc, sh          : (1, Cout) f32            per-channel scale / shift
      o               : (1, Hout, Wout, Cout)    output
      [s1, s2]        : (1, 1, Cout) f32         per-image sum / sum-of-squares
    """
    x_refs = refs[:n_in]
    w_refs = refs[n_in:2 * n_in]
    sc_ref = refs[2 * n_in]
    sh_ref = refs[2 * n_in + 1]
    o_ref = refs[2 * n_in + 2]

    _, Hout, Wout, Cout = o_ref.shape
    R = tile_rows
    n_blk = Hout // R
    M = R * Wout

    # Hoisted broadcasts (JAX does not CSE broadcast_in_dim inside loops).
    sc = jnp.broadcast_to(sc_ref[...], (M, Cout))
    sh = jnp.broadcast_to(sh_ref[...], (M, Cout))

    def block_body(b, carry):
        s1, s2 = carry
        r0 = b * R
        if not isinstance(r0, int):
            r0 = pl.multiple_of(r0, R)
        acc = jnp.zeros((M, Cout), jnp.float32)
        for kh in range(k):                     # static tap loops -> unrolled
            for kw in range(k):
                t = kh * k + kw
                for xi in range(n_in):
                    cin = x_refs[xi].shape[3]
                    xs = x_refs[xi][0, pl.ds(r0 + kh * d, R),
                                    pl.ds(kw * d, Wout), :]
                    xs = xs.reshape(M, cin)     # (TILE_H*Wout, Cin)
                    acc = acc + jnp.dot(xs, w_refs[xi][t],
                                        preferred_element_type=jnp.float32)
        y = acc * sc + sh                       # (M, Cout) f32
        if emit_stats:
            s1 = s1 + jnp.sum(y, axis=0, keepdims=True)
            s2 = s2 + jnp.sum(y * y, axis=0, keepdims=True)
        if act == 'relu':
            y = jnp.maximum(y, 0.0)
        elif act == 'leaky':
            y = jnp.where(y >= 0.0, y, 0.2 * y)
        elif act == 'tanh':
            y = jnp.tanh(y)
        o_ref[0, pl.ds(r0, R), :, :] = y.reshape(R, Wout, Cout).astype(o_ref.dtype)
        return s1, s2

    init = (jnp.zeros((1, Cout), jnp.float32),
            jnp.zeros((1, Cout), jnp.float32))
    if n_blk <= 8:
        carry = init
        for b in range(n_blk):                  # short trip count: fully unrolled
            carry = block_body(b, carry)
        s1, s2 = carry
    else:
        s1, s2 = lax.fori_loop(0, n_blk, block_body, init)
    if emit_stats:
        refs[2 * n_in + 3][0] = s1
        refs[2 * n_in + 4][0] = s2


def _affine_act_kernel(y_ref, sc_ref, sh_ref, o_ref, *, act):
    y = y_ref[...].astype(jnp.float32) * sc_ref[...] + sh_ref[...]
    if act == 'relu':
        y = jnp.maximum(y, 0.0)
    elif act == 'leaky':
        y = jnp.where(y >= 0.0, y, 0.2 * y)
    elif act == 'tanh':
        y = jnp.tanh(y)
    o_ref[...] = y.astype(o_ref.dtype)


# ---------------------------------------------------------------------------
# Pallas wrappers
# ---------------------------------------------------------------------------
def _pick_tile_rows(Hout, Wout, target_m=256):
    """Smallest divisor of Hout with TILE_H*Wout >= target (else full image)."""
    for r in range(1, Hout + 1):
        if Hout % r == 0 and r * Wout >= target_m:
            return r
    return Hout


def _pick_tile_m(M, L):
    """Row-block for the lane-dense affine pass (<= ~2 MiB, 8-aligned divisor)."""
    cap = max(1, min(1024, (2 * 1024 * 1024) // max(1, 4 * L)))
    if M <= cap:
        return M
    for t in range(cap, 0, -1):
        if M % t == 0 and t % 8 == 0:
            return t
    return M


def pallas_conv(xs, wmats, scale, shift, *, k, d, Hout, Wout, act, emit_stats,
                out_dtype=jnp.bfloat16):
    """Dense stride-1 conv (dilation d, kernel k) over 1..2 inputs, fused epilogue."""
    n_in = len(xs)
    N = xs[0].shape[0]
    Cout = wmats[0].shape[-1]
    He_exp = Hout + (k - 1) * d
    We_exp = Wout + (k - 1) * d

    in_specs, args = [], []
    for x, wm in zip(xs, wmats):
        _, He, We, Cin = x.shape
        assert He == He_exp and We == We_exp
        assert wm.shape == (k * k, Cin, Cout)
        in_specs.append(pl.BlockSpec((1, He, We, Cin), lambda n: (n, 0, 0, 0)))
        args.append(x.astype(jnp.bfloat16))
    for wm in wmats:
        in_specs.append(pl.BlockSpec(wm.shape, lambda n: (0, 0, 0)))
        args.append(wm.astype(jnp.bfloat16))
    in_specs += [pl.BlockSpec((1, Cout), lambda n: (0, 0)),
                 pl.BlockSpec((1, Cout), lambda n: (0, 0))]
    args += [scale.reshape(1, Cout).astype(jnp.float32),
             shift.reshape(1, Cout).astype(jnp.float32)]

    out_shapes = [jax.ShapeDtypeStruct((N, Hout, Wout, Cout), out_dtype)]
    out_specs = [pl.BlockSpec((1, Hout, Wout, Cout), lambda n: (n, 0, 0, 0))]
    if emit_stats:
        out_shapes += [jax.ShapeDtypeStruct((N, 1, Cout), jnp.float32)] * 2
        out_specs += [pl.BlockSpec((1, 1, Cout), lambda n: (n, 0, 0))] * 2

    res = pl.pallas_call(
        functools.partial(_conv_kernel, n_in=n_in, k=k, d=d, act=act,
                          emit_stats=emit_stats,
                          tile_rows=_pick_tile_rows(Hout, Wout)),
        out_shape=tuple(out_shapes),
        grid_spec=pltpu.PrefetchScalarGridSpec(
            num_scalar_prefetch=0,
            grid=(N,),
            in_specs=in_specs,
            out_specs=tuple(out_specs)),
        compiler_params=pltpu.CompilerParams(
            dimension_semantics=("parallel",),
            vmem_limit_bytes=_VMEM_LIMIT),
    )(*args)
    return res if emit_stats else res[0]


def pallas_affine_act(y, scale, shift, act, out_dtype=jnp.bfloat16):
    """Lane-dense per-channel affine + activation over an NHWC tensor.

    Views (N,H,W,C) as (N*H, W*C) so every store is a full-lane vector op.
    """
    N, H, W, C = y.shape
    M, L = N * H, W * C
    y2 = y.reshape(M, L)
    sc = jnp.tile(scale.astype(jnp.float32).reshape(1, C), (1, W))
    sh = jnp.tile(shift.astype(jnp.float32).reshape(1, C), (1, W))
    tm = _pick_tile_m(M, L)
    out = pl.pallas_call(
        functools.partial(_affine_act_kernel, act=act),
        out_shape=jax.ShapeDtypeStruct((M, L), out_dtype),
        grid_spec=pltpu.PrefetchScalarGridSpec(
            num_scalar_prefetch=0,
            grid=(M // tm,),
            in_specs=[pl.BlockSpec((tm, L), lambda i: (i, 0)),
                      pl.BlockSpec((1, L), lambda i: (0, 0)),
                      pl.BlockSpec((1, L), lambda i: (0, 0))],
            out_specs=pl.BlockSpec((tm, L), lambda i: (i, 0))),
        compiler_params=pltpu.CompilerParams(
            dimension_semantics=("parallel",),
            vmem_limit_bytes=_VMEM_LIMIT),
    )(y2, sc, sh)
    return out.reshape(N, H, W, C)


# ---------------------------------------------------------------------------
# ConvBlock (Conv2d / ConvTranspose2d + BatchNorm + activation)
# ---------------------------------------------------------------------------
def make_conv_block(key, kind, in_c, out_c, ksize=4, stride=1, dil=1,
                    norm=False, act='relu', split_in=None):
    k1, k2 = jax.random.split(key)
    fan_in = in_c * ksize * ksize
    lim = 1.0 / (float(fan_in) ** 0.5)
    b = jax.random.uniform(k2, (out_c,), jnp.float32, -lim, lim)
    blk = dict(kind=kind, ksize=ksize, stride=stride, dil=dil, norm=norm,
               act=act, out_c=out_c)

    if kind == 'conv':
        w = jax.random.uniform(k1, (out_c, in_c, ksize, ksize), jnp.float32,
                               -lim, lim)
        w_t = jnp.transpose(w, (2, 3, 1, 0))                  # (kh, kw, ci, co)
        if stride > 1:
            assert ksize % stride == 0
            ke, s = ksize // stride, stride
            w6 = w_t.reshape(ke, s, ke, s, in_c, out_c)       # (a, ri, b, rj, ci, co)
            w6 = jnp.transpose(w6, (0, 2, 1, 3, 4, 5))        # (a, b, ri, rj, ci, co)
            wm = w6.reshape(ke * ke, s * s * in_c, out_c)
            blk.update(k_eff=ke, d_eff=1)
        else:
            wm = w_t.reshape(ksize * ksize, in_c, out_c)
            blk.update(k_eff=ksize, d_eff=dil)
        blk['wmats'] = [wm.astype(jnp.bfloat16)]
        blk['bias'] = b
    else:  # 'deconv': ConvTranspose2d, phase (sub-pixel) decomposition
        s = stride
        assert ksize == 4 and s == 2, "phase decomposition specialized to k=4,s=2"
        ke = ksize // s + 1                                    # 3
        w = jax.random.uniform(k1, (in_c, out_c, ksize, ksize), jnp.float32,
                               -lim, lim)
        wp = jnp.zeros((ke, ke, in_c, s * s * out_c), jnp.float32)
        for ty in range(ke):
            for tx in range(ke):
                for r in range(s):
                    for c in range(s):
                        kh = (ksize - 1) - s * ty + r
                        kw = (ksize - 1) - s * tx + c
                        if 0 <= kh < ksize and 0 <= kw < ksize:
                            p = r * s + c
                            wp = wp.at[ty, tx, :, p * out_c:(p + 1) * out_c].set(
                                w[:, :, kh, kw])
        wm = wp.reshape(ke * ke, in_c, s * s * out_c).astype(jnp.bfloat16)
        if split_in is not None:
            blk['wmats'] = [wm[:, :split_in, :], wm[:, split_in:, :]]
        else:
            blk['wmats'] = [wm]
        blk['bias'] = jnp.tile(b, s * s)                       # per-phase bias
        blk.update(k_eff=ke, d_eff=1)

    if norm:
        blk['gamma'] = jnp.ones((out_c,), jnp.float32)
        blk['beta'] = jnp.zeros((out_c,), jnp.float32)
    return blk


def conv_block_apply(blk, x, skip=None):
    """x (+ optional skip) : (N, H, W, C) bf16 NHWC -> (N, Hout, Wout, Cout)."""
    N, H, W, _ = x.shape
    k, s, d = blk['ksize'], blk['stride'], blk['dil']
    ke, de = blk['k_eff'], blk['d_eff']
    out_c = blk['out_c']

    if blk['kind'] == 'deconv':
        # Phase-decomposed ConvTranspose2d: stride-1 ke=3 conv over the undilated
        # input (pad 1) emitting s*s*Cout phase channels, interleaved afterwards.
        xs = [x] if skip is None else [x, skip]
        xs_p = [jnp.pad(xi, ((0, 0), (1, 1), (1, 1), (0, 0))).astype(jnp.bfloat16)
                for xi in xs]
        Hc, Wc = H, W
        cout_eff = s * s * out_c
        ones_eff = jnp.ones((cout_eff,), jnp.float32)
        if blk['norm']:
            y, s1, s2 = pallas_conv(xs_p, blk['wmats'], ones_eff, blk['bias'],
                                    k=ke, d=1, Hout=Hc, Wout=Wc,
                                    act='none', emit_stats=True)
            cnt = jnp.float32(N * Hc * Wc * s * s)
            tot = jnp.sum(s1, axis=0).reshape(s * s, out_c).sum(axis=0)
            tot2 = jnp.sum(s2, axis=0).reshape(s * s, out_c).sum(axis=0)
            mean = tot / cnt
            var = jnp.maximum(tot2 / cnt - mean * mean, 0.0)
            inv = lax.rsqrt(var + 1e-5)
            scale = blk['gamma'] * inv
            shift = blk['beta'] - mean * scale
            y = pallas_affine_act(y, jnp.tile(scale, s * s),
                                  jnp.tile(shift, s * s), blk['act'])
        else:
            y = pallas_conv(xs_p, blk['wmats'], ones_eff, blk['bias'],
                            k=ke, d=1, Hout=Hc, Wout=Wc,
                            act=blk['act'], emit_stats=False)
        # pixel-shuffle / depth-to-space interleave of the s*s phases.
        # TODO(synk): fold this into the conv store to avoid the extra HBM pass.
        y = y.reshape(N, Hc, Wc, s, s, out_c)
        y = jnp.transpose(y, (0, 1, 3, 2, 4, 5)).reshape(N, Hc * s, Wc * s, out_c)
        return y

    # Conv2d path
    Hout, Wout = H // s, W // s
    p2y = s * (Hout - 1) + (k - 1) * (d - 1) + k - H
    p2x = s * (Wout - 1) + (k - 1) * (d - 1) + k - W
    xe = jnp.pad(x, ((0, 0), (p2y // 2, p2y - p2y // 2),
                     (p2x // 2, p2x - p2x // 2), (0, 0)))
    if s > 1:
        # space-to-depth -> dense stride-1 conv with k_eff=k/s, Cin_eff=s*s*C
        # TODO(synk): fuse s2d into strided kernel loads to avoid this HBM round trip.
        Hp, Wp = xe.shape[1], xe.shape[2]
        Ht = max(-(-Hp // s), Hout + ke - 1) * s
        Wt = max(-(-Wp // s), Wout + ke - 1) * s
        xe = jnp.pad(xe, ((0, 0), (0, Ht - Hp), (0, Wt - Wp), (0, 0)))
        xe = xe.reshape(N, Ht // s, s, Wt // s, s, -1)
        xe = jnp.transpose(xe, (0, 1, 3, 2, 4, 5)).reshape(N, Ht // s, Wt // s, -1)
    xe = xe.astype(jnp.bfloat16)

    ones_c = jnp.ones((out_c,), jnp.float32)
    if blk['norm']:
        # pass 1: conv + bias, emitting per-image partial sum / sum-of-squares.
        # (stats are f32; y is stored bf16 — tiny rounding mismatch vs f32 BN)
        y, s1, s2 = pallas_conv([xe], blk['wmats'], ones_c, blk['bias'],
                                k=ke, d=de, Hout=Hout, Wout=Wout,
                                act='none', emit_stats=True)
        cnt = jnp.float32(N * Hout * Wout)
        tot = jnp.sum(s1, axis=0).reshape(-1)
        tot2 = jnp.sum(s2, axis=0).reshape(-1)
        mean = tot / cnt
        var = jnp.maximum(tot2 / cnt - mean * mean, 0.0)
        inv = lax.rsqrt(var + 1e-5)
        scale = blk['gamma'] * inv
        shift = blk['beta'] - mean * scale
        return pallas_affine_act(y, scale, shift, blk['act'])
    # norm=False: single fused pass (conv + bias + activation)
    return pallas_conv([xe], blk['wmats'], ones_c, blk['bias'],
                       k=ke, d=de, Hout=Hout, Wout=Wout,
                       act=blk['act'], emit_stats=False)


# ---------------------------------------------------------------------------
# grid_sample / warp_flow / trilinear interpolation (plain-JAX glue: gathers)
# ---------------------------------------------------------------------------
def grid_sample(img, grid):
    """F.grid_sample, bilinear, align_corners=True, zeros padding.
    img: (N,C,H,W), grid: (N,Hg,Wg,2) in [-1,1] -> (N,C,Hg,Wg)"""
    N, C, H, W = img.shape
    gx = (grid[..., 0] + 1.0) * 0.5 * (W - 1)
    gy = (grid[..., 1] + 1.0) * 0.5 * (H - 1)
    x0 = jnp.floor(gx)
    y0 = jnp.floor(gy)
    x1, y1 = x0 + 1.0, y0 + 1.0
    wx1, wy1 = gx - x0, gy - y0
    wx0, wy0 = 1.0 - wx1, 1.0 - wy1
    batch_idx = jnp.arange(N)[:, None, None]

    def gather(ix, iy):
        valid = (ix >= 0) & (ix <= W - 1) & (iy >= 0) & (iy <= H - 1)
        ixc = jnp.clip(ix, 0, W - 1).astype(jnp.int32)
        iyc = jnp.clip(iy, 0, H - 1).astype(jnp.int32)
        vals = img[batch_idx, :, iyc, ixc]          # (N,Hg,Wg,C)
        return jnp.where(valid[..., None], vals, 0.0)

    out = (gather(x0, y0) * (wx0 * wy0)[..., None]
           + gather(x1, y0) * (wx1 * wy0)[..., None]
           + gather(x0, y1) * (wx0 * wy1)[..., None]
           + gather(x1, y1) * (wx1 * wy1)[..., None])
    return jnp.transpose(out, (0, 3, 1, 2))


def warp_flow(tensor, flow):
    """Warp `tensor` (N,C,H,W) by pixel-space `flow` (N,H,W,2)."""
    h, w = tensor.shape[-2:]
    ramp_u = jnp.broadcast_to(jnp.arange(w, dtype=jnp.float32)[None, :], (h, w))
    ramp_v = jnp.broadcast_to(jnp.arange(h, dtype=jnp.float32)[:, None], (h, w))
    grid = jnp.stack([ramp_u, ramp_v], -1)[None] + flow
    gx = grid[..., 0] / (w - 1)
    gy = grid[..., 1] / (h - 1)
    grid = jnp.stack([gx, gy], -1) * 2.0 - 1.0
    return grid_sample(tensor, grid)


def interp_time(x, t_out):
    """F.interpolate(x, (t_out, 4, 7), 'trilinear', align_corners=True) for
    x of shape (1,C,T_in,4,7): only the temporal axis needs interpolation."""
    T_in = x.shape[2]
    pos = jnp.arange(t_out, dtype=jnp.float32) * (T_in - 1) / (t_out - 1)
    lo = jnp.floor(pos).astype(jnp.int32)
    hi = jnp.minimum(lo + 1, T_in - 1)
    w_hi = (pos - lo.astype(jnp.float32))[None, None, :, None, None]
    return x[:, :, lo] * (1.0 - w_hi) + x[:, :, hi] * w_hi


# ---------------------------------------------------------------------------
# Factormatte model
# ---------------------------------------------------------------------------
def init_factormatte(key, nf, in_c, max_frames, coarseness):
    keys = iter(jax.random.split(key, 64))
    enc = [
        make_conv_block(next(keys), 'conv', in_c, nf, 4, 2, 1, False, 'relu'),
        make_conv_block(next(keys), 'conv', nf, nf * 2, 4, 2, 1, True, 'leaky'),
        make_conv_block(next(keys), 'conv', nf * 2, nf * 4, 4, 2, 1, True, 'leaky'),
        make_conv_block(next(keys), 'conv', nf * 4, nf * 4, 4, 2, 1, True, 'leaky'),
        make_conv_block(next(keys), 'conv', nf * 4, nf * 4, 4, 2, 1, True, 'leaky'),
        make_conv_block(next(keys), 'conv', nf * 4, nf * 4, 4, 1, 2, True, 'leaky'),
        make_conv_block(next(keys), 'conv', nf * 4, nf * 4, 4, 1, 2, True, 'leaky'),
    ]
    # decoder weights split along Cin so (x, skip) never need an HBM concat
    dec = [
        make_conv_block(next(keys), 'deconv', nf * 8, nf * 4, 4, 2, 1, True, 'relu',
                        split_in=nf * 4),
        make_conv_block(next(keys), 'deconv', nf * 8, nf * 4, 4, 2, 1, True, 'relu',
                        split_in=nf * 4),
        make_conv_block(next(keys), 'deconv', nf * 8, nf * 2, 4, 2, 1, True, 'relu',
                        split_in=nf * 4),
        make_conv_block(next(keys), 'deconv', nf * 4, nf, 4, 2, 1, True, 'relu',
                        split_in=nf * 2),
        make_conv_block(next(keys), 'deconv', nf * 2, nf, 4, 2, 1, True, 'relu',
                        split_in=nf),
    ]
    final_rgb = [
        make_conv_block(next(keys), 'conv', nf, nf, 4, 1, 1, True, 'relu'),
        make_conv_block(next(keys), 'conv', nf, 3, 4, 1, 1, False, 'tanh'),
    ]
    final_aflow = [make_conv_block(next(keys), 'conv', nf, nf // 2, 4, 1, 1, True, 'relu')]
    blk_a = make_conv_block(next(keys), 'conv', nf // 2, 1, 4, 1, 1, False, 'tanh')
    blk_f = make_conv_block(next(keys), 'conv', nf // 2, 2, 4, 1, 1, False, 'none')
    # fused a+flow head: one Cout=3 conv; tanh on channel 0 applied in JAX afterwards
    fused = dict(blk_a)
    fused['out_c'] = 3
    fused['wmats'] = [jnp.concatenate([blk_a['wmats'][0], blk_f['wmats'][0]], axis=-1)]
    fused['bias'] = jnp.concatenate([blk_a['bias'], blk_f['bias']])
    fused['act'] = 'none'
    return dict(
        encoder=enc, decoder=dec, final_rgb=final_rgb, final_aflow=final_aflow,
        final_a_flow=fused,
        bg_offset=jnp.zeros((1, 2, max_frames // coarseness, 4, 7), jnp.float32),
        brightness_scale=jnp.ones((1, 1, max_frames // coarseness, 4, 7), jnp.float32),
        max_frames=max_frames)


def _apply_seq(blocks, x):
    for blk in blocks:
        x = conv_block_apply(blk, x)
    return x


def render(params, x_nchw):
    # NHWC + bf16 end-to-end inside the UNet; NCHW/f32 only at the boundary.
    x = jnp.transpose(x_nchw, (0, 2, 3, 1)).astype(jnp.bfloat16)
    skips = [x]
    for i, blk in enumerate(params['encoder']):
        x = conv_block_apply(blk, x)
        if i < 5:
            skips.append(x)
    for blk in params['decoder']:
        x = conv_block_apply(blk, x, skips.pop())       # skip passed, not concat'ed
    rgb = _apply_seq(params['final_rgb'], x)
    aflow = _apply_seq(params['final_aflow'], x)
    af = conv_block_apply(params['final_a_flow'], aflow)
    a = jnp.tanh(af[..., 0:1].astype(jnp.float32)).astype(af.dtype)
    flow = af[..., 1:3]
    rgba = jnp.concatenate([rgb, a], axis=-1)
    rgba = jnp.transpose(rgba, (0, 3, 1, 2)).astype(jnp.float32)
    flow = jnp.transpose(flow, (0, 3, 1, 2)).astype(jnp.float32)
    feat = jnp.transpose(x, (0, 3, 1, 2)).astype(jnp.float32)
    return rgba, flow, feat


def factormatte_forward(params, opt, inp, bg_flow, bg_warp, jitter, index, do_adj):
    b_sz, n_layers, channels, height, width = inp.shape
    input_t = inp[:, :, :channels // 2]
    input_t1 = inp[:, :, channels // 2:]
    bg_warp = jnp.concatenate([bg_warp[:, :2], bg_warp[:, 2:]], axis=0)
    bg_flow = jnp.concatenate([bg_flow[:, :2], bg_flow[:, 2:]], axis=0)
    jitter = jnp.concatenate([jitter[:, :2], jitter[:, 2:]], axis=0)
    index = jnp.transpose(index, (1, 0)).reshape(-1)

    composite_rgb = None
    composite_rgb_no_cube = None
    composite_flow = bg_flow
    layers_rgba, layers_flow, alphas_warped, rgbs_warped = [], [], [], []
    composite_warped = None

    max_frames = params['max_frames']
    jitter_grid = jnp.transpose(jitter, (0, 2, 3, 1))
    bg_offset = interp_time(params['bg_offset'], max_frames)          # (1,2,T,4,7)
    bg_offset = jnp.transpose(bg_offset[0][:, index], (1, 0, 2, 3))   # (2B,2,4,7)
    bg_offset = grid_sample(bg_offset, jitter_grid)                   # (2B,2,H,W)
    br_scale = interp_time(params['brightness_scale'], max_frames)
    br_scale = br_scale[0, 0][index][:, None]                         # (2B,1,4,7)
    br_scale = grid_sample(br_scale, jitter_grid)                     # (2B,1,H,W)

    for i in range(n_layers):
        input_i = jnp.concatenate([input_t[:, i], input_t1[:, i]], axis=0)
        rgba, flow, _last_feat = render(params, input_i)
        alpha = rgba[:, 3:4] * 0.5 + 0.5
        if i == 0:
            # TODO(synk): opt.get_bg branch (saves panorama PNG via PIL) not translated.
            if not opt['bg_noise']:
                rgba = input_i[:, -4:]
            rgba = grid_sample(rgba, jnp.transpose(bg_warp, (0, 2, 3, 1)))
            if do_adj:
                rgba = warp_flow(rgba, jnp.transpose(bg_offset, (0, 2, 3, 1)))
            composite_rgb = rgba
            composite_rgb_no_cube = rgba
            flow = bg_flow
            rgba_warped = rgba[:b_sz]
            composite_warped = rgba_warped[:, :3]
        else:
            if i == 3 - opt['fg_layer_ind']:
                composite_rgb_no_cube = rgba * alpha + composite_rgb_no_cube * (1.0 - alpha)
            composite_rgb = rgba * alpha + composite_rgb * (1.0 - alpha)
            composite_flow = flow * alpha + composite_flow * (1.0 - alpha)
            rgba_t1 = rgba[b_sz:]
            rgba_warped = warp_flow(rgba_t1, jnp.transpose(flow[:b_sz], (0, 2, 3, 1)))
            alpha_warped = rgba_warped[:, 3:4] * 0.5 + 0.5
            composite_warped = (rgba_warped[:, :3] * alpha_warped
                                + composite_warped * (1.0 - alpha_warped))
        layers_rgba.append(rgba)
        layers_flow.append(flow)
        alphas_warped.append(rgba_warped[:, 3:4])
        rgbs_warped.append(rgba_warped[:, :3])

    if do_adj:
        composite_rgb = br_scale * (composite_rgb * 0.5 + 0.5)
        composite_rgb = jnp.clip(composite_rgb, 0.0, 1.0) * 2.0 - 1.0
        composite_rgb_no_cube = br_scale * (composite_rgb_no_cube * 0.5 + 0.5)
        composite_rgb_no_cube = jnp.clip(composite_rgb_no_cube, 0.0, 1.0) * 2.0 - 1.0

    composite_rgb = jnp.concatenate([composite_rgb[:b_sz], composite_rgb[b_sz:]], axis=1)
    composite_rgb_no_cube = jnp.concatenate(
        [composite_rgb_no_cube[:b_sz], composite_rgb_no_cube[b_sz:]], axis=1)
    composite_flow = jnp.concatenate([composite_flow[:b_sz], composite_flow[b_sz:]], axis=1)

    layers_rgba = jnp.stack(layers_rgba, axis=2)
    # TODO(synk): `do_adj and not opt.isTrain` per-layer in-place brightness adjust
    # is skipped (opt.isTrain == True in this synthetic setup, matching reference).
    layers_rgba = jnp.concatenate([layers_rgba[:b_sz], layers_rgba[b_sz:]], axis=1)
    layers_flow = jnp.stack(layers_flow, axis=2)
    layers_flow = jnp.concatenate([layers_flow[:b_sz], layers_flow[b_sz:]], axis=1)
    br_scale = jnp.concatenate([br_scale[:b_sz], br_scale[b_sz:]], axis=1)
    bg_offset = jnp.concatenate([bg_offset[:b_sz], bg_offset[b_sz:]], axis=1)

    return {
        'reconstruction_rgb_no_cube': composite_rgb_no_cube,
        'reconstruction_rgb': composite_rgb,
        'reconstruction_flow': composite_flow,
        'layers_rgba': layers_rgba,
        'layers_flow': layers_flow,
        'alpha_warped': jnp.stack(alphas_warped, axis=2),
        'rgb_warped': jnp.stack(rgbs_warped, axis=2),
        'reconstruction_warped': composite_warped,
        'bg_offset': bg_offset,
        'brightness_scale': br_scale,
    }


# ---------------------------------------------------------------------------
if __name__ == "__main__":
    key = jax.random.PRNGKey(0)
    k_param, k_in, k_flow, k_warp, k_jit = jax.random.split(key, 5)

    B, L, in_c, H, W = 1, 2, 8, 32, 32
    nf, max_frames, coarseness = 8, 8, 2
    opt = dict(get_bg=False, bg_noise=True, fg_layer_ind=2, isTrain=True)

    params = init_factormatte(k_param, nf, in_c, max_frames, coarseness)

    inp = jax.random.normal(k_in, (B, L, 2 * in_c, H, W), jnp.float32) * 0.5
    bg_flow = jax.random.normal(k_flow, (B, 4, H, W), jnp.float32) * 2.0
    bg_warp = jax.random.uniform(k_warp, (B, 4, H, W), jnp.float32, -1.0, 1.0)
    jitter = jax.random.uniform(k_jit, (B, 4, H, W), jnp.float32, -1.0, 1.0)
    index = jnp.array([[2, 5]], dtype=jnp.int32)          # (B, 2) frame indices

    outputs = factormatte_forward(params, opt, inp, bg_flow, bg_warp, jitter,
                                  index, do_adj=True)
    jax.block_until_ready(outputs)
    print("KERNEL_OK")
</pallas_src>

<mosaic_0001>
module attributes {stable_mosaic.version = 11 : i64} {
  func.func @_conv_kernel(%arg0: i32, %arg1: memref<1x17x17x32xbf16, #tpu.memory_space<vmem>>, %arg2: memref<4x32x8xbf16, #tpu.memory_space<vmem>>, %arg3: memref<1x8xf32, #tpu.memory_space<vmem>>, %arg4: memref<1x8xf32, #tpu.memory_space<vmem>>, %arg5: memref<1x16x16x8xbf16, #tpu.memory_space<vmem>>) attributes {dimension_semantics = [#tpu.dimension_semantics<parallel>], iteration_bounds = array<i64: 2>, scalar_prefetch = 0 : i64, scratch_operands = 0 : i64, tpu.core_type = #tpu.core_type<tc>, window_params = [{transform_indices = @transform_0, window_bounds = array<i64: 1, 17, 17, 32>}, {pipeline_mode = #tpu.pipeline_mode<synchronous>, transform_indices = @transform_1, window_bounds = array<i64: 4, 32, 8>}, {pipeline_mode = #tpu.pipeline_mode<synchronous>, transform_indices = @transform_2, window_bounds = array<i64: 1, 8>}, {pipeline_mode = #tpu.pipeline_mode<synchronous>, transform_indices = @transform_3, window_bounds = array<i64: 1, 8>}, {transform_indices = @transform_4, window_bounds = array<i64: 1, 16, 16, 8>}]} {
    %c0 = arith.constant 0 : index
    %c0_0 = arith.constant 0 : index
    %0 = vector.load %arg3[%c0, %c0_0] : memref<1x8xf32, #tpu.memory_space<vmem>>, vector<1x8xf32>
    %1 = vector.shape_cast %0 : vector<1x8xf32> to vector<1x8xf32>
    %2 = vector.broadcast %1 : vector<1x8xf32> to vector<256x8xf32>
    %c0_1 = arith.constant 0 : index
    %c0_2 = arith.constant 0 : index
    %3 = vector.load %arg4[%c0_1, %c0_2] : memref<1x8xf32, #tpu.memory_space<vmem>>, vector<1x8xf32>
    %4 = vector.shape_cast %3 : vector<1x8xf32> to vector<1x8xf32>
    %5 = vector.broadcast %4 : vector<1x8xf32> to vector<256x8xf32>
    %cst = arith.constant 0.000000e+00 : f32
    %6 = vector.broadcast %cst : f32 to vector<256x8xf32>
    %c0_3 = arith.constant 0 : index
    %c0_4 = arith.constant 0 : index
    %c0_5 = arith.constant 0 : index
    %c0_6 = arith.constant 0 : index
    %7 = vector.load %arg1[%c0_3, %c0_4, %c0_5, %c0_6] : memref<1x17x17x32xbf16, #tpu.memory_space<vmem>>, vector<1x16x16x32xbf16>
    %8 = vector.shape_cast %7 : vector<1x16x16x32xbf16> to vector<16x16x32xbf16>
    %9 = vector.shape_cast %8 : vector<16x16x32xbf16> to vector<256x32xbf16>
    %c0_7 = arith.constant 0 : index
    %c0_8 = arith.constant 0 : index
    %c0_9 = arith.constant 0 : index
    %10 = vector.load %arg2[%c0_7, %c0_8, %c0_9] : memref<4x32x8xbf16, #tpu.memory_space<vmem>>, vector<1x32x8xbf16>
    %11 = vector.shape_cast %10 : vector<1x32x8xbf16> to vector<32x8xbf16>
    %cst_10 = arith.constant dense<0.000000e+00> : vector<256x8xf32>
    %12 = tpu.matmul %9, %11, %cst_10 {dimension_numbers = #tpu.dot_dimension_numbers<[1], [0], [0], [1], [0, 0, 1, 1], [], []>} : vector<256x32xbf16>, vector<32x8xbf16>, vector<256x8xf32> -> vector<256x8xf32>
    %13 = arith.addf %6, %12 : vector<256x8xf32>
    %c0_11 = arith.constant 0 : index
    %c0_12 = arith.constant 0 : index
    %c1 = arith.constant 1 : index
    %c0_13 = arith.constant 0 : index
    %14 = vector.load %arg1[%c0_11, %c0_12, %c1, %c0_13] : memref<1x17x17x32xbf16, #tpu.memory_space<vmem>>, vector<1x16x16x32xbf16>
    %15 = vector.shape_cast %14 : vector<1x16x16x32xbf16> to vector<16x16x32xbf16>
    %16 = vector.shape_cast %15 : vector<16x16x32xbf16> to vector<256x32xbf16>
    %c1_14 = arith.constant 1 : index
    %c0_15 = arith.constant 0 : index
    %c0_16 = arith.constant 0 : index
    %17 = vector.load %arg2[%c1_14, %c0_15, %c0_16] : memref<4x32x8xbf16, #tpu.memory_space<vmem>>, vector<1x32x8xbf16>
    %18 = vector.shape_cast %17 : vector<1x32x8xbf16> to vector<32x8xbf16>
    %cst_17 = arith.constant dense<0.000000e+00> : vector<256x8xf32>
    %19 = tpu.matmul %16, %18, %cst_17 {dimension_numbers = #tpu.dot_dimension_numbers<[1], [0], [0], [1], [0, 0, 1, 1], [], []>} : vector<256x32xbf16>, vector<32x8xbf16>, vector<256x8xf32> -> vector<256x8xf32>
    %20 = arith.addf %13, %19 : vector<256x8xf32>
    %c0_18 = arith.constant 0 : index
    %c1_19 = arith.constant 1 : index
    %c0_20 = arith.constant 0 : index
    %c0_21 = arith.constant 0 : index
    %21 = vector.load %arg1[%c0_18, %c1_19, %c0_20, %c0_21] : memref<1x17x17x32xbf16, #tpu.memory_space<vmem>>, vector<1x16x16x32xbf16>
    %22 = vector.shape_cast %21 : vector<1x16x16x32xbf16> to vector<16x16x32xbf16>
    %23 = vector.shape_cast %22 : vector<16x16x32xbf16> to vector<256x32xbf16>
    %c2 = arith.constant 2 : index
    %c0_22 = arith.constant 0 : index
    %c0_23 = arith.constant 0 : index
    %24 = vector.load %arg2[%c2, %c0_22, %c0_23] : memref<4x32x8xbf16, #tpu.memory_space<vmem>>, vector<1x32x8xbf16>
    %25 = vector.shape_cast %24 : vector<1x32x8xbf16> to vector<32x8xbf16>
    %cst_24 = arith.constant dense<0.000000e+00> : vector<256x8xf32>
    %26 = tpu.matmul %23, %25, %cst_24 {dimension_numbers = #tpu.dot_dimension_numbers<[1], [0], [0], [1], [0, 0, 1, 1], [], []>} : vector<256x32xbf16>, vector<32x8xbf16>, vector<256x8xf32> -> vector<256x8xf32>
    %27 = arith.addf %20, %26 : vector<256x8xf32>
    %c0_25 = arith.constant 0 : index
    %c1_26 = arith.constant 1 : index
    %c1_27 = arith.constant 1 : index
    %c0_28 = arith.constant 0 : index
    %28 = vector.load %arg1[%c0_25, %c1_26, %c1_27, %c0_28] : memref<1x17x17x32xbf16, #tpu.memory_space<vmem>>, vector<1x16x16x32xbf16>
    %29 = vector.shape_cast %28 : vector<1x16x16x32xbf16> to vector<16x16x32xbf16>
    %30 = vector.shape_cast %29 : vector<16x16x32xbf16> to vector<256x32xbf16>
    %c3 = arith.constant 3 : index
    %c0_29 = arith.constant 0 : index
    %c0_30 = arith.constant 0 : index
    %31 = vector.load %arg2[%c3, %c0_29, %c0_30] : memref<4x32x8xbf16, #tpu.memory_space<vmem>>, vector<1x32x8xbf16>
    %32 = vector.shape_cast %31 : vector<1x32x8xbf16> to vector<32x8xbf16>
    %cst_31 = arith.constant dense<0.000000e+00> : vector<256x8xf32>
    %33 = tpu.matmul %30, %32, %cst_31 {dimension_numbers = #tpu.dot_dimension_numbers<[1], [0], [0], [1], [0, 0, 1, 1], [], []>} : vector<256x32xbf16>, vector<32x8xbf16>, vector<256x8xf32> -> vector<256x8xf32>
    %34 = arith.addf %27, %33 : vector<256x8xf32>
    %35 = arith.mulf %34, %2 : vector<256x8xf32>
    %36 = arith.addf %35, %5 : vector<256x8xf32>
    %cst_32 = arith.constant 0.000000e+00 : f32
    %37 = vector.broadcast %cst_32 : f32 to vector<256x8xf32>
    %38 = arith.maximumf %36, %37 : vector<256x8xf32>
    %39 = vector.shape_cast %38 : vector<256x8xf32> to vector<16x16x8xf32>
    %40 = arith.truncf %39 : vector<16x16x8xf32> to vector<16x16x8xbf16>
    %c0_33 = arith.constant 0 : index
    %c0_34 = arith.constant 0 : index
    %c0_35 = arith.constant 0 : index
    %c0_36 = arith.constant 0 : index
    %41 = vector.load %arg5[%c0_33, %c0_34, %c0_35, %c0_36] : memref<1x16x16x8xbf16, #tpu.memory_space<vmem>>, vector<1x16x16x8xbf16>
    %42 = vector.shape_cast %41 : vector<1x16x16x8xbf16> to vector<16x16x8xbf16>
    %43 = vector.shape_cast %40 : vector<16x16x8xbf16> to vector<1x16x16x8xbf16>
    tpu.vector_store %arg5[%c0_33, %c0_34, %c0_35, %c0_36], %43 {strides = array<i32>} : memref<1x16x16x8xbf16, #tpu.memory_space<vmem>>, vector<1x16x16x8xbf16>,
    return
  }
  func.func @transform_0(%arg0: i32) -> (i32, i32, i32, i32) {
    %c0_i32 = arith.constant 0 : i32
    %c0_i32_0 = arith.constant 0 : i32
    %c0_i32_1 = arith.constant 0 : i32
    %c0_i32_2 = arith.constant 0 : i32
    return %arg0, %c0_i32, %c0_i32_0, %c0_i32_1 : i32, i32, i32, i32
  }
  func.func @transform_1(%arg0: i32) -> (i32, i32, i32) {
    %c0_i32 = arith.constant 0 : i32
    %c0_i32_0 = arith.constant 0 : i32
    %c0_i32_1 = arith.constant 0 : i32
    %c0_i32_2 = arith.constant 0 : i32
    return %c0_i32, %c0_i32_0, %c0_i32_1 : i32, i32, i32
  }
  func.func @transform_2(%arg0: i32) -> (i32, i32) {
    %c0_i32 = arith.constant 0 : i32
    %c0_i32_0 = arith.constant 0 : i32
    %c0_i32_1 = arith.constant 0 : i32
    return %c0_i32, %c0_i32_0 : i32, i32
  }
  func.func @transform_3(%arg0: i32) -> (i32, i32) {
    %c0_i32 = arith.constant 0 : i32
    %c0_i32_0 = arith.constant 0 : i32
    %c0_i32_1 = arith.constant 0 : i32
    return %c0_i32, %c0_i32_0 : i32, i32
  }
  func.func @transform_4(%arg0: i32) -> (i32, i32, i32, i32) {
    %c0_i32 = arith.constant 0 : i32
    %c0_i32_0 = arith.constant 0 : i32
    %c0_i32_1 = arith.constant 0 : i32
    %c0_i32_2 = arith.constant 0 : i32
    return %arg0, %c0_i32, %c0_i32_0, %c0_i32_1 : i32, i32, i32, i32
  }
}

</mosaic_0001>

<bundles_post_ra>
// kernel: tpu_custom_call.1
= control target key start
LH: loop header
LB: loop body
LE: loop exit
PB: predicated region body
PF: predicated region fallthrough
CT: control target
= control target key end

     0   :  { %9 = vsyncpa [#allocation3], 0  ;;  %s4612_s0 = inlined_call_operand.hbm [shape: bf16[2,17,17,32], index: 0, kind: input, shape index: {}]   ;;  %s4613_s1 = inlined_call_operand.hbm [shape: bf16[4,32,8], index: 1, kind: input, shape index: {}]   ;;  %s4614_s2 = inlined_call_operand.hbm [shape: f32[1,8], index: 2, kind: input, shape index: {}]   ;;  %s4615_s3 = inlined_call_operand.hbm [shape: f32[1,8], index: 3, kind: input, shape index: {}]   ;;  %s4616_s4 = inlined_call_operand.hbm [shape: bf16[2,16,16,8], index: 4, kind: output, shape index: {}]  }
   0x1   :  { %11 = vsyncpa [#allocation3 + $0x1], 0 }
   0x2   :  { %12 = vsyncpa [#allocation6], 0 }
   0x3   :  { %13 = vsyncpa [#allocation9], 0 }
   0x4   :  { %14 = vsyncpa [#allocation4], 0 }
   0x5   :  { %16 = vsyncpa [#allocation4 + $0x1], 0  ;;  %s3728_s15 = smov 0   ;;  %s3730_s16 = smov 0  }
   0x6   :  { %s3732_s17 = smov 0   ;;  %s3734_s18 = smov 0  }
   0x7 LB: > { %s3749_s19 = sadd.s32 4294967295, %s3692_s18   ;;  %s2768_s20 = sadd.s32 4294967294, %s3692_s18   ;;  %s3692_s18 = sphi %s3734_s18, %s4641_s18   ;;  %s3688_s17 = sphi %s3732_s17, %s4640_s17   ;;  %s3684_s16 = sphi %s3730_s16, %s4639_s16   ;;  %s3680_s15 = sphi %s3728_s15, %s4638_s15  }
   0x8   : > { %p42_p0 = scmp.ne.s32.totalorder %s3684_s16, %s3680_s15  ;;  %p4617_p1 = scmp.eq.s32.totalorder %s3749_s19, 0 }
   0x9   : > { %p135_p3 = scmp.eq.s32.totalorder %s2768_s20, 1  ;;  %p2769_p5 = scmp.ge.s32.totalorder %s3692_s18, 1 }
   0xa   : > { %p3758_p4 = por %p4617_p1, %p42_p0  ;;  %p142_p7 = scmp.lt.s32.totalorder %s3692_s18, 3 }
   0xb   : > { %p3763_p6 = por %p135_p3, %p42_p0  ;;  %s3694_s24 = smov [#allocation5]  }
   0xc   : > { %s4620_s21 = scalar_select %p3758_p4, 1, 0 }
   0xd   : > { %s4621_s22 = scalar_select %p3763_p6, 1, 0 }
   0xe   : > { %p3768_p8 = pnand %p2769_p5, %p142_p7  ;;  %s154_s25 = sshll.u32 %s3694_s24, 4  ;;  %s3772_s25 = int_to_ptr.vmem [resolvable:$true] %s154_s25 }
   0xf   : > { %s3695_s27 = smov [#allocation7]   ;;  %s3696_s29 = smov [#allocation8]  }
  0x10   : > { %s4622_s23 = scalar_select %p3768_p8, 1, 0 }
  0x11   : > { %p3399_p9 = pneg %p3768_p8  ;;  %s168_s28 = sshll.u32 %s3695_s27, 4  ;;  %s3783_s28 = int_to_ptr.vmem [resolvable:$true] %s168_s28 }
  0x12   : > { %s3785_s30 = sshll.u32 %s3696_s29, 4  ;;  %s3504_s7 = scalar_lea.hbm %s4613_s1, 1024  ;;  %s180_s30 = int_to_ptr.vmem [resolvable:$true] %s3785_s30 }
  0x13   : > { %p3779_p11 = pnand %p3399_p9, %p4617_p1  ;;  %p3505_p12 = scmp.ne.s32.totalorder %s4613_s1, %s3504_s7 }
  0x14   : > { %p3511_p5 = scmp.lt.u32.totalorder %s3504_s7, %s4613_s1 }
  0x15   : > { %p3795_p13 = pneg %p3779_p11 }
  0x17   : > { %p3507_p0 = pnand %p3795_p13, %p3505_p12 }
  0x19   : > { %p3508_p3 = pneg %p3507_p0 }
  0x1b   : > { %p3513_p7 = pnand %p3511_p5, %p3508_p3 }
  0x1d   : > { %3516 = shalt.err (!%p3513_p7)
}
  0x1e   : > { %s3517_s13 = scalar_lea.vmem %s3772_s25, 1024  ;;  %p3525_p2 = scmp.lt.s32.totalorder %s3772_s25, %s3772_s25 }
  0x1f   : > { %p3518_p9 = scmp.ne.s32.totalorder %s3772_s25, %s3517_s13  ;;  %p3526_p6 = scmp.lt.s32.totalorder %s3517_s13, %s3517_s13 }
  0x21   : > { %p3520_p10 = pnand %p3518_p9, %p3795_p13  ;;  %p3527_p12 = por %p3526_p6, %p3525_p2 }
  0x23   : > { %p3521_p1 = pneg %p3520_p10 }
  0x25   : > { %p3528_p0 = pnand %p3527_p12, %p3521_p1 }
  0x27   : > { %3531 = shalt.err (!%p3528_p0)
}
  0x28   : > { %s3697_s14 = smov 64   ;;  %s3698_s20 = smov 4  }
  0x29   : > { %3402 = dma.hbm_to_vmem [thread:$0]  (!%p3779_p11), %s4613_s1, 1024, %s3772_s25, [#allocation6], %s3697_s14, %s3697_s14, %s3698_s20  }
  0x2a   : > { %s3532_s6 = scalar_lea.hbm %s4614_s2, 16 }
  0x2b   : > { %p3533_p1 = scmp.ne.s32.totalorder %s4614_s2, %s3532_s6  ;;  %p3539_p10 = scmp.lt.u32.totalorder %s3532_s6, %s4614_s2 }
  0x2d   : > { %p3535_p2 = pnand %p3533_p1, %p3795_p13 }
  0x2f   : > { %p3536_p6 = pneg %p3535_p2 }
  0x31   : > { %p3541_p3 = pnand %p3539_p10, %p3536_p6 }
  0x33   : > { %3544 = shalt.err (!%p3541_p3)
}
  0x34   : > { %s3545_s25 = scalar_lea.vmem %s3783_s28, 16  ;;  %s3552_s12 = scalar_lea.vmem %s3783_s28, 32 }
  0x35   : > { %p3546_p5 = scmp.ne.s32.totalorder %s3783_s28, %s3545_s25  ;;  %p3553_p12 = scmp.lt.s32.totalorder %s3783_s28, %s3783_s28 }
  0x36   : > { %p3554_p0 = scmp.lt.s32.totalorder %s3552_s12, %s3545_s25 }
  0x37   : > { %p3548_p7 = pnand %p3546_p5, %p3795_p13 }
  0x38   : > { %p3555_p1 = por %p3554_p0, %p3553_p12 }
  0x39   : > { %p3549_p9 = pneg %p3548_p7 }
  0x3b   : > { %p3556_p2 = pnand %p3555_p1, %p3549_p9 }
  0x3d   : > { %3559 = shalt.err (!%p3556_p2)
}
  0x3e   : > { %3405 = dma.hbm_to_vmem [thread:$0]  (!%p3779_p11), %s4614_s2, 16, %s3783_s28, [#allocation6]  }
  0x3f   : > { %s3560_s5 = scalar_lea.hbm %s4615_s3, 16 }
  0x40   : > { %p3561_p6 = scmp.ne.s32.totalorder %s4615_s3, %s3560_s5  ;;  %p3567_p5 = scmp.lt.u32.totalorder %s3560_s5, %s4615_s3 }
  0x42   : > { %p3563_p10 = pnand %p3561_p6, %p3795_p13 }
  0x44   : > { %p3564_p3 = pneg %p3563_p10 }
  0x46   : > { %p3569_p7 = pnand %p3567_p5, %p3564_p3 }
  0x48   : > { %3572 = shalt.err (!%p3569_p7)
}
  0x49   : > { %s3573_s11 = scalar_lea.vmem %s180_s30, 16  ;;  %s3580_s28 = scalar_lea.vmem %s180_s30, 32 }
  0x4a   : > { %p3574_p9 = scmp.ne.s32.totalorder %s180_s30, %s3573_s11  ;;  %p3581_p1 = scmp.lt.s32.totalorder %s180_s30, %s180_s30 }
  0x4b   : > { %p3582_p2 = scmp.lt.s32.totalorder %s3580_s28, %s3573_s11 }
  0x4c   : > { %p3576_p12 = pnand %p3574_p9, %p3795_p13 }
  0x4d   : > { %p3583_p4 = por %p3582_p2, %p3581_p1 }
  0x4e   : > { %p3577_p0 = pneg %p3576_p12 }
  0x50   : > { %p3584_p8 = pnand %p3583_p4, %p3577_p0 }
  0x52   : > { %3587 = shalt.err (!%p3584_p8)
}
  0x53   : > { %3408 = dma.hbm_to_vmem [thread:$0]  (!%p3779_p11), %s4615_s3, 16, %s180_s30, [#allocation9]  }
  0x54   : > { %s3863_s10 = sadd.s32 1, %s3692_s18   ;;  %s29_s26 = sadd.s32 1, %s3688_s17 }
  0x55   : > { %s26_s13 = ssub.s32 %s3692_s18, %s3863_s10  ;;  %p36_p8 = scmp.ne.s32.totalorder %s3688_s17, %s3684_s16 }
  0x56   : > { %p27_p4 = scmp.eq.s32.totalorder %s26_s13, 0  ;;  %p37_p13 = scmp.eq.s32.totalorder %s3692_s18, 0 }
  0x57   : > { %p3420_p6 = scmp.lt.s32.totalorder %s3692_s18, 2  ;;  %p4625_p3 = scmp.eq.s32.totalorder %s3749_s19, 1 }
  0x58   : > { %s3873_s24 = scalar_select %p27_p4, %s3688_s17, %s29_s26  }
  0x59   : > { %p38_p10 = por %p37_p13, %p36_p8  ;;  %p3877_p5 = por %p4625_p3, %p36_p8 }
  0x5a   : > { %s190_s29 = sand.u32 1, %s3688_s17   ;;  %s3381_s5 = smul.u32 3264, %s3692_s18 }
  0x5b   : > { %s3380_s30 = smul.u32 204, %s190_s29  ;;  %p3883_p11 = pnand %p3420_p6, %p38_p10 }
  0x5c   : > { %s3890_s9 = scalar_lea.hbm %s4612_s0, %s3381_s5  ;;  %s3894_s25 = scalar_lea.sflag [#allocation3], %s190_s29 }
  0x5d   : > { %s194_s11 = scalar_lea.vmem [#allocation2], %s3380_s30  ;;  %s3588_s12 = scalar_lea.hbm %s3890_s9, 3264 }
  0x5e   : > { %s201_s28 = sshll.u32 %s194_s11, 4  ;;  %p3589_p7 = scmp.ne.s32.totalorder %s3890_s9, %s3588_s12  ;;  %s3892_s28 = int_to_ptr.vmem [resolvable:$true] %s201_s28 }
  0x5f   : > { %p3590_p9 = pneg %p3883_p11  ;;  %s3593_s5 = scalar_lea.hbm %s4612_s0, 6528 }
  0x60   : > { %p3594_p1 = scmp.lt.u32.totalorder %s3890_s9, %s4612_s0  ;;  %p3595_p2 = scmp.lt.u32.totalorder %s3593_s5, %s3588_s12 }
  0x61   : > { %p3591_p12 = pnand %p3590_p9, %p3589_p7  ;;  %p3597_p8 = scmp.lt.u32.totalorder %s3588_s12, %s3890_s9 }
  0x62   : > { %p3596_p4 = por %p3595_p2, %p3594_p1 }
  0x63   : > { %p3592_p0 = pneg %p3591_p12 }
  0x64   : > { %p3598_p13 = por %p3597_p8, %p3596_p4 }
  0x66   : > { %p3599_p6 = pnand %p3598_p13, %p3592_p0 }
  0x68   : > { %3602 = shalt.err (!%p3599_p6)
}
  0x69   : > { %s3603_s29 = scalar_lea.vmem %s3892_s28, 3264  ;;  %s3699_s30 = smov [#allocation2]  }
  0x6a   : > { %p3604_p10 = scmp.ne.s32.totalorder %s3892_s28, %s3603_s29  ;;  %s3608_s11 = sshll.u32 %s3699_s30, 4  ;;  %s3609_s11 = int_to_ptr.vmem [resolvable:$false] %s3608_s11 }
  0x6b   : > { %s3610_s13 = scalar_lea.vmem %s3609_s11, 6528  ;;  %p3611_p12 = scmp.lt.s32.totalorder %s3892_s28, %s3609_s11 }
  0x6c   : > { %p3606_p3 = pnand %p3604_p10, %p3590_p9  ;;  %p3612_p1 = scmp.lt.s32.totalorder %s3610_s13, %s3603_s29 }
  0x6e   : > { %p3607_p7 = pneg %p3606_p3  ;;  %p3613_p2 = por %p3612_p1, %p3611_p12 }
  0x70   : > { %p3614_p4 = pnand %p3613_p2, %p3607_p7 }
  0x72   : > { %3617 = shalt.err (!%p3614_p4)
}
  0x73   : > { %3412 = dma.hbm_to_vmem [thread:$0]  (!%p3883_p11), %s3890_s9, 3264, %s3892_s28, %s3894_s25, %s3697_s14, %s3697_s14, %s3698_s20  }
  0x74   : > { %p4628_p9 = scmp.ne.s32.totalorder %s4622_s23, 0 }
  0x75   : > { %s3928_s12 = sand.u32 (!%p4628_p9), 1, %s3684_s16   ;;  %p4629_p0 = scmp.ne.s32.totalorder (!%p4628_p9), %s4620_s21, 0 }
  0x76   : > { %213 = sbr.rel (%p4628_p9) target bundleno = 523 (0x20b), region = 36  ;;  %s216_s5 = scalar_lea.sflag (!%p4628_p9), [#allocation3], %s3928_s12 }
  0x77   : > { %s3382_s26 = smul.u32 (!%p4628_p9), 204, %s3928_s12 }
  0x79   : > { %s3932_s7 = scalar_lea.vmem (!%p4628_p9), [#allocation2], %s3382_s26 }
  0x7d   : > { %3663 = dma.done.wait (%p4629_p0), %s216_s5, 3264  }
  0x7e   : > { %3665 = vsyncadd (%p4629_p0), %s216_s5, 4294964032  ;;  %p4630_p11 = scmp.eq.s32.totalorder %s3749_s19, 0 }
  0x80   : > { %3667 = dma.done.wait (%p4630_p11), [#allocation6], 1040   ;;  %p4631_p8 = pmov %p4630_p11 }
  0x82   : > { %3669 = vsyncadd (%p4631_p8), [#allocation6], 4294966256  ;;  %p4632_p13 = pmov %p4631_p8 }
  0x83   : > { %p4633_p6 = pmov %p4631_p8 }
  0x84   : > { %3671 = dma.done.wait (%p4632_p13), [#allocation9], 16  }
  0x85   : > { %3673 = vsyncadd (%p4633_p6), [#allocation9], 4294967280  ;;  %v3464_v0 = vld [vmem:[#allocation5 + $0x20] sm:$0xff]   ;;  %v3465_v1 = vld [vmem:[#allocation5 + $0x10] sm:$0xff]   ;;  %vm323_vm0 = vsmask.f32 3328 }
  0x86   : > { %vm324_vm1 = vsmask.f32 7440  ;;  %3212 = vmatprep.subr.bf16.mxu0 %v3464_v0  ;;  %v3466_v2 = vld [vmem:[#allocation5 + $0x28] sm:$0xff]   ;;  %3140 = vmatprep.subr.bf16.mxu1 %v3465_v1  ;;  %v3467_v3 = vld [vmem:[#allocation5 + $0x18] sm:$0xff]   ;;  %vm775_vm2 = vcmask 261120   ;;  %v3960_v14 = vld [vmem:[#allocation5] sm:$0xff]  }
  0x87   : > { %3213 = vmatpush3.bf16.msra.mxu0 %v3464_v0  ;;  %3141 = vmatpush3.bf16.msra.mxu1 %v3465_v1  ;;  %v3468_v4 = vld [vmem:[%s3932_s7 + $0xc] sm:$0xff]   ;;  %v3469_v5 = vld [vmem:[%s3932_s7 + $0x18] sm:$0xff]   ;;  %v3950_v6 = vld [vmem:[%s3932_s7] sm:$0xf]  ;;  %s2779_s21 = sshll.u32 %s3928_s12, 7  ;;  %vm2619_vm4 = vcmask 60416  }
  0x88   : > { %3214 = vmatprep.subr.bf16.mxu0 %v3466_v2  ;;  %3142 = vmatprep.subr.bf16.mxu1 %v3467_v3  ;;  %v3953_v7 = vld [vmem:[%s3932_s7 + $0x4] sm:$0xf]  ;;  %v307_v8 = vld [vmem:[%s3932_s7 + $0x8] sm:$0x1]  ;;  %v327_v9 = vshrl.u32 %v3950_v6, 16  ;;  %v330_v10 = vshll.u32 %v3950_v6, 16  ;;  %vm3977_vm3 = vmor %vm323_vm0, %vm324_vm1 }
  0x89   : > { %3216 = vmatprep.mubr.msk.bf16.mxu0 %vm775_vm2, %v3468_v4  ;;  %v336_v11 = vshll.u32 %v3953_v7, 16  ;;  %v340_v12 = vshrl.u32 %v3953_v7, 16  ;;  %v346_v13 = vshll.u32 %v307_v8, 16  ;;  %v2816_v15 = vcombine.low %v3950_v6, %v3953_v7  ;;  %v3471_v21 = vld [vmem:[#allocation5 + $0x30] sm:$0xff]   ;;  %v3970_v23 = vld [vmem:[%s3932_s7 + $0x10] sm:$0xf] }
  0x8a   : > { %v329_v16 = vrot.slane %v327_v9, 4  ;;  %v332_v17 = vrot.slane %v330_v10, 5  ;;  %v3967_v22 = vld [vmem:[%s3932_s7 + $0xc] sm:$0xf]  ;;  %v308_v26 = vld [vmem:[%s3932_s7 + $0x14] sm:$0x1] }
  0x8b   : > { %3215 = vmatpush3.bf16.msra.mxu0 %v3466_v2  ;;  %3143 = vmatpush3.bf16.msra.mxu1 %v3467_v3  ;;  %v338_v18 = vrot.slane %v336_v11, 5  ;;  %v342_v19 = vrot.slane %v340_v12, 4  ;;  %v348_v20 = vrot.slane %v346_v13, 5  ;;  %v351_v27 = vshrl.u32 %v3967_v22, 16  ;;  %v3472_v33 = vld [vmem:[%s3932_s7 + $0x24] sm:$0xff]   ;;  %v3473_v42 = vld [vmem:[%s3932_s7 + $0x30] sm:$0xff]  }
  0x8c   : > { %3176 = vmatprep.subr.bf16.mxu1 %v3960_v14  ;;  %v333_v24 = vor.u32 %v332_v17, %v329_v16  ;;  %v354_v28 = vshll.u32 %v3967_v22, 16  ;;  %3248 = vmatprep.subr.bf16.mxu0 %v3471_v21  ;;  %v360_v30 = vshll.u32 %v3970_v23, 16  ;;  %v364_v31 = vshrl.u32 %v3970_v23, 16  ;;  %v3993_v46 = vld [vmem:[%s3932_s7 + $0x18] sm:$0xf]  ;;  %v3474_v4 = vld [vmem:[%s3932_s7 + $0x3c] sm:$0xff]  }
  0x8d   : > { %v343_v25 = vor.u32 %v342_v19, %v338_v18  ;;  %v370_v32 = vshll.u32 %v308_v26, 16  ;;  %v2817_v34 = vcombine.low %v3967_v22, %v3970_v23  ;;  %v353_v37 = vrot.slane %v351_v27, 4  ;;  %v3996_v47 = vld [vmem:[%s3932_s7 + $0x1c] sm:$0xf]  ;;  %v309_v48 = vld [vmem:[%s3932_s7 + $0x20] sm:$0x1] }
  0x8e   : > { %3217 = vmatmul.mubr.msk.bf16.vlgmr.msra.gmra.mrb[0].mxu0 %vm775_vm2, %v3469_v5  ;;  %v334_v35 = vrot.slane %v333_v24, 4  ;;  %v356_v38 = vrot.slane %v354_v28, 5  ;;  %v362_v39 = vrot.slane %v360_v30, 5  ;;  %v366_v40 = vrot.slane %v364_v31, 4  ;;  %v4002_v53 = vld [vmem:[%s3932_s7 + $0x24] sm:$0xf] }
  0x8f   : > { %v344_v36 = vrot.slane %v343_v25, 4  ;;  %3249 = vmatpush3.bf16.msra.mxu0 %v3471_v21  ;;  %v372_v41 = vrot.slane %v370_v32, 5  ;;  %3220 = vmatprep.mubr.msk.bf16.mxu0 %vm775_vm2, %v3472_v33  ;;  %v375_v51 = vshrl.u32 %v3993_v46, 16  ;;  %v378_v52 = vshll.u32 %v3993_v46, 16  ;;  %v4005_v54 = vld [vmem:[%s3932_s7 + $0x28] sm:$0xf] }
  0x90   : > { %v339_v43 = vsel %vm3977_vm3, %v334_v35, %v338_v18  ;;  %v357_v45 = vor.u32 %v356_v38, %v353_v37  ;;  %v367_v50 = vor.u32 %v366_v40, %v362_v39  ;;  %v384_v56 = vshll.u32 %v3996_v47, 16  ;;  %v310_v59 = vld [vmem:[%s3932_s7 + $0x2c] sm:$0x1]  ;;  %v4024_v18 = vld [vmem:[%s3932_s7 + $0x30] sm:$0xf]  ;;  %v3476_v19 = vld [vmem:[%s3932_s7 + $0x54] sm:$0xff]  }
  0x91   : > { %v349_v44 = vsel %vm3977_vm3, %v344_v36, %v348_v20  ;;  %v388_v57 = vshrl.u32 %v3996_v47, 16  ;;  %v394_v58 = vshll.u32 %v309_v48, 16  ;;  %v377_v61 = vrot.slane %v375_v51, 4  ;;  %v3475_v17 = vld [vmem:[%s3932_s7 + $0x48] sm:$0xff]   ;;  %v4028_v25 = vld [vmem:[%s3932_s7 + $0x34] sm:$0xf] }
  0x92   : > { %v2782_v49 = vcombine.low %v339_v43, %v349_v44  ;;  %v358_v55 = vrot.slane %v357_v45, 4  ;;  %v368_v60 = vrot.slane %v367_v50, 4  ;;  %v380_v62 = vrot.slane %v378_v52, 5  ;;  %v311_v31 = vld [vmem:[%s3932_s7 + $0x38] sm:$0x1]  ;;  %s4439_s23 = scalar_lea.vmem [#allocation10], %s2779_s21 }
  0x93   : > { %v399_v63 = vshrl.u32 %v4002_v53, 16  ;;  %v386_v1 = vrot.slane %v384_v56, 5  ;;  %v390_v2 = vrot.slane %v388_v57, 4  ;;  %v396_v3 = vrot.slane %v394_v58, 5  ;;  %v4038_v38 = vld [vmem:[%s3932_s7 + $0x3c] sm:$0xf] }
  0x94   : > { %3144 = vmatprep.mubr.msk.bf16.mxu1 %vm775_vm2, %v2782_v49  ;;  %v363_v0 = vsel %vm3977_vm3, %v358_v55, %v362_v39  ;;  %v373_v5 = vsel %vm3977_vm3, %v368_v60, %v372_v41  ;;  %v381_v8 = vor.u32 %v380_v62, %v377_v61  ;;  %v402_v10 = vshll.u32 %v4002_v53, 16  ;;  %v4044_v43 = vld [vmem:[%s3932_s7 + $0x40] sm:$0xf]  ;;  %v312_v49 = vld [vmem:[%s3932_s7 + $0x44] sm:$0x1]  ;;  %s3067_s14 = sshll.u32 %s3749_s19, 11 }
  0x95   : > { %v401_v9 = vrot.slane %v399_v63, 4  ;;  %v2783_v11 = vcombine.low %v363_v0, %v373_v5  ;;  %v391_v12 = vor.u32 %v390_v2, %v386_v1  ;;  %v408_v13 = vshll.u32 %v4005_v54, 16  ;;  %v4059_v0 = vld [vmem:[%s3932_s7 + $0x48] sm:$0xf]  ;;  %s2666_s20 = sshll.u32 %s4439_s23, 4  ;;  %s4560_s28 = scalar_lea.hbm %s4616_s4, %s3067_s14  ;;  %s4562_s20 = int_to_ptr.vmem [resolvable:$true] %s2666_s20 }
  0x96   : > { %3221 = vmatmul.mubr.msk.bf16.gmra.mrb[4].mxu0 %vm775_vm2, %v3473_v42  ;;  %v412_v16 = vshrl.u32 %v4005_v54, 16  ;;  %v382_v20 = vrot.slane %v381_v8, 4  ;;  %v404_v21 = vrot.slane %v402_v10, 5  ;;  %v418_v24 = vshll.u32 %v310_v59, 16  ;;  %v3477_v8 = vld [vmem:[%s3932_s7 + $0x60] sm:$0xff]   ;;  %v3478_v10 = vld [vmem:[%s3932_s7 + $0x6c] sm:$0xff]  }
  0x97   : > { %3224 = vmatprep.mubr.msk.bf16.mxu0 %vm775_vm2, %v3474_v4  ;;  %v423_v26 = vshrl.u32 %v4024_v18, 16  ;;  %3145 = vmatmul.mubr.msk.bf16.vlgmr.msra.gmra.mrb[0].mxu1 %vm775_vm2, %v2783_v11  ;;  %v392_v27 = vrot.slane %v391_v12, 4  ;;  %v410_v28 = vrot.slane %v408_v13, 5  ;;  %v426_v32 = vshll.u32 %v4024_v18, 16  ;;  %s2653_s19 = scalar_lea.sflag [#allocation4], %s3928_s12  ;;  %s3618_s25 = scalar_lea.vmem %s4562_s20, 2048 }
  0x98   : > { %v414_v30 = vrot.slane %v412_v16, 4  ;;  %3177 = vmatpush3.bf16.msra.mxu1 %v3960_v14  ;;  %v387_v33 = vsel %vm3977_vm3, %v382_v20, %v386_v1  ;;  %v405_v35 = vor.u32 %v404_v21, %v401_v9  ;;  %v420_v36 = vrot.slane %v418_v24, 5  ;;  %v3480_v1 = vld [vmem:[#allocation5 + $0x8] sm:$0xff]   ;;  %v4064_v9 = vld [vmem:[%s3932_s7 + $0x4c] sm:$0xf]  ;;  %p3619_p10 = scmp.ne.s32.totalorder %s4562_s20, %s3618_s25  ;;  %s3700_s8 = smov [#allocation10]  }
  0x99   : > { %v425_v37 = vrot.slane %v423_v26, 4  ;;  %v397_v39 = vsel %vm3977_vm3, %v392_v27, %v396_v3  ;;  %v428_v41 = vrot.slane %v426_v32, 5  ;;  %v432_v42 = vshll.u32 %v4028_v25, 16  ;;  %v313_v16 = vld [vmem:[%s3932_s7 + $0x50] sm:$0x1]  ;;  %3178 = vmatprep.subr.bf16.mxu1 %v3480_v1  ;;  %s3622_s29 = sshll.u32 %s3700_s8, 4  ;;  %s3623_s29 = int_to_ptr.vmem [resolvable:$false] %s3622_s29 }
  0x9a   : > { %v415_v40 = vor.u32 %v414_v30, %v410_v28  ;;  %v2784_v44 = vcombine.low %v387_v33, %v397_v39  ;;  %v406_v14 = vrot.slane %v405_v35, 4  ;;  %v436_v45 = vshrl.u32 %v4028_v25, 16  ;;  %v4074_v27 = vld [vmem:[%s3932_s7 + $0x54] sm:$0xf]  ;;  %v4079_v33 = vld [vmem:[%s3932_s7 + $0x58] sm:$0xf]  ;;  %p3620_p3 = pnand %p3619_p10, %p3877_p5  ;;  %p3625_p12 = scmp.lt.s32.totalorder %s4562_s20, %s3623_s29 }
  0x9b   : > { %v442_v48 = vshll.u32 %v311_v31, 16  ;;  %v429_v51 = vor.u32 %v428_v41, %v425_v37  ;;  %v434_v52 = vrot.slane %v432_v42, 5  ;;  %v447_v55 = vshrl.u32 %v4038_v38, 16  ;;  %s3624_s30 = scalar_lea.vmem %s3623_s29, 4096 }
  0x9c   : > { %v416_v50 = vrot.slane %v415_v40, 4  ;;  %3148 = vmatprep.mubr.msk.bf16.mxu1 %vm775_vm2, %v2784_v44  ;;  %v411_v56 = vsel %vm3977_vm3, %v406_v14, %v410_v28  ;;  %v438_v57 = vrot.slane %v436_v45, 4  ;;  %v450_v59 = vshll.u32 %v4038_v38, 16  ;;  %3179 = vmatpush3.bf16.msra.mxu1 %v3480_v1  ;;  %p3621_p7 = pneg %p3620_p3  ;;  %p3626_p1 = scmp.lt.s32.totalorder %s3624_s30, %s3618_s25 }
  0x9d   : > { %v444_v58 = vrot.slane %v442_v48, 5  ;;  %v430_v61 = vrot.slane %v429_v51, 4  ;;  %v449_v62 = vrot.slane %v447_v55, 4  ;;  %v456_v63 = vshll.u32 %v4044_v43, 16 }
  0x9e   : > { %3225 = vmatmul.mubr.msk.bf16.gmra.mrb[8].mxu0 %vm775_vm2, %v3475_v17  ;;  %v421_v60 = vsel %vm3977_vm3, %v416_v50, %v420_v36  ;;  %v439_v3 = vor.u32 %v438_v57, %v434_v52  ;;  %v452_v4 = vrot.slane %v450_v59, 5  ;;  %v460_v5 = vshrl.u32 %v4044_v43, 16  ;;  %v4093_v57 = vld [vmem:[%s3932_s7 + $0x60] sm:$0xf]  ;;  %p3627_p2 = por %p3626_p1, %p3625_p12 }
  0x9f   : > { %3228 = vmatprep.mubr.msk.bf16.mxu0 %vm775_vm2, %v3476_v19  ;;  %v2785_v2 = vcombine.low %v411_v56, %v421_v60  ;;  %v435_v11 = vsel %vm3977_vm3, %v430_v61, %v434_v52  ;;  %v458_v12 = vrot.slane %v456_v63, 5  ;;  %v466_v13 = vshll.u32 %v312_v49, 16  ;;  %v3481_v19 = vld [vmem:[#allocation5 + $0x38] sm:$0xff]   ;;  %v314_v49 = vld [vmem:[%s3932_s7 + $0x5c] sm:$0x1] }
  0xa0   : > { %v471_v17 = vshrl.u32 %v4059_v0, 16  ;;  %v440_v20 = vrot.slane %v439_v3, 4  ;;  %v453_v21 = vor.u32 %v452_v4, %v449_v62  ;;  %v462_v24 = vrot.slane %v460_v5, 4  ;;  %3250 = vmatprep.subr.bf16.mxu0 %v3481_v19  ;;  %v3479_v62 = vld [vmem:[%s3932_s7 + $0x78] sm:$0xff]   ;;  %v4100_v63 = vld [vmem:[%s3932_s7 + $0x64] sm:$0xf]  ;;  %p3628_p4 = pnand %p3627_p2, %p3621_p7 }
  0xa1   : > { %3149 = vmatmul.mubr.msk.bf16.gmra.mrb[4].mxu1 %vm775_vm2, %v2785_v2  ;;  %v474_v26 = vshll.u32 %v4059_v0, 16  ;;  %v468_v28 = vrot.slane %v466_v13, 5  ;;  %v480_v31 = vshll.u32 %v4064_v9, 16  ;;  %v484_v32 = vshrl.u32 %v4064_v9, 16  ;;  %3251 = vmatpush3.bf16.msra.mxu0 %v3481_v19  ;;  %v315_v5 = vld [vmem:[%s3932_s7 + $0x68] sm:$0x1] }
  0xa2   : > { %v473_v30 = vrot.slane %v471_v17, 4  ;;  %v445_v35 = vsel %vm3977_vm3, %v440_v20, %v444_v58  ;;  %v454_v36 = vrot.slane %v453_v21, 4  ;;  %v463_v37 = vor.u32 %v462_v24, %v458_v12 }
  0xa3   : > { %v476_v39 = vrot.slane %v474_v26, 5  ;;  %v2786_v40 = vcombine.low %v435_v11, %v445_v35  ;;  %v482_v41 = vrot.slane %v480_v31, 5  ;;  %v486_v42 = vrot.slane %v484_v32, 4  ;;  %v4117_v31 = vld [vmem:[%s3932_s7 + $0x70] sm:$0xf] }
  0xa4   : > { %v490_v44 = vshll.u32 %v313_v16, 16  ;;  %v459_v14 = vsel %vm3977_vm3, %v454_v36, %v458_v12  ;;  %v464_v45 = vrot.slane %v463_v37, 4  ;;  %v495_v50 = vshrl.u32 %v4074_v27, 16 }
  0xa5   : > { %v477_v48 = vor.u32 %v476_v39, %v473_v30  ;;  %3152 = vmatprep.mubr.msk.bf16.mxu1 %vm775_vm2, %v2786_v40  ;;  %v487_v51 = vor.u32 %v486_v42, %v482_v41  ;;  %v498_v55 = vshll.u32 %v4074_v27, 16  ;;  %v504_v56 = vshll.u32 %v4079_v33, 16  ;;  %v4114_v30 = vld [vmem:[%s3932_s7 + $0x6c] sm:$0xf]  ;;  %v316_v39 = vld [vmem:[%s3932_s7 + $0x74] sm:$0x1] }
  0xa6   : > { %3229 = vmatmul.mubr.msk.bf16.gmra.mrb[12].mxu0 %vm775_vm2, %v3477_v8  ;;  %v492_v52 = vrot.slane %v490_v44, 5  ;;  %v469_v58 = vsel %vm3977_vm3, %v464_v45, %v468_v28  ;;  %v497_v60 = vrot.slane %v495_v50, 4  ;;  %v508_v61 = vshrl.u32 %v4079_v33, 16  ;;  %v3482_v8 = vld [vmem:[%s3932_s7 + $0x84] sm:$0xff]  }
  0xa7   : > { %3232 = vmatprep.mubr.msk.bf16.mxu0 %vm775_vm2, %v3478_v10  ;;  %v478_v59 = vrot.slane %v477_v48, 4  ;;  %v2787_v1 = vcombine.low %v459_v14, %v469_v58  ;;  %v488_v2 = vrot.slane %v487_v51, 4  ;;  %v500_v3 = vrot.slane %v498_v55, 5  ;;  %v3483_v14 = vld [vmem:[%s3932_s7 + $0x90] sm:$0xff]   ;;  %v3484_v58 = vld [vmem:[%s3932_s7 + $0x9c] sm:$0xff]  }
  0xa8   : > { %v506_v4 = vrot.slane %v504_v56, 5  ;;  %v510_v11 = vrot.slane %v508_v61, 4  ;;  %v514_v12 = vshll.u32 %v314_v49, 16  ;;  %v519_v13 = vshrl.u32 %v4093_v57, 16 }
  0xa9   : > { %v483_v10 = vsel %vm3977_vm3, %v478_v59, %v482_v41  ;;  %3153 = vmatmul.mubr.msk.bf16.gmra.mrb[8].mxu1 %vm775_vm2, %v2787_v1  ;;  %v493_v16 = vsel %vm3977_vm3, %v488_v2, %v492_v52  ;;  %v501_v17 = vor.u32 %v500_v3, %v497_v60  ;;  %v522_v19 = vshll.u32 %v4093_v57, 16  ;;  %v4133_v1 = vld [vmem:[%s3932_s7 + $0x78] sm:$0xf]  ;;  %v4136_v2 = vld [vmem:[%s3932_s7 + $0x7c] sm:$0xf] }
  0xaa   : > { %v528_v20 = vshll.u32 %v4100_v63, 16  ;;  %v2788_v21 = vcombine.low %v483_v10, %v493_v16  ;;  %v511_v24 = vor.u32 %v510_v11, %v506_v4  ;;  %v516_v26 = vrot.slane %v514_v12, 5 }
  0xab   : > { %v521_v28 = vrot.slane %v519_v13, 4  ;;  %v502_v32 = vrot.slane %v501_v17, 4  ;;  %v524_v35 = vrot.slane %v522_v19, 5  ;;  %v532_v37 = vshrl.u32 %v4100_v63, 16  ;;  %v4147_v17 = vld [vmem:[%s3932_s7 + $0x84] sm:$0xf] }
  0xac   : > { %v530_v36 = vrot.slane %v528_v20, 5  ;;  %3156 = vmatprep.mubr.msk.bf16.mxu1 %vm775_vm2, %v2788_v21  ;;  %v512_v40 = vrot.slane %v511_v24, 4  ;;  %v538_v41 = vshll.u32 %v315_v5, 16  ;;  %v543_v42 = vshrl.u32 %v4114_v30, 16 }
  0xad   : > { %v546_v44 = vshll.u32 %v4114_v30, 16  ;;  %v507_v45 = vsel %vm3977_vm3, %v502_v32, %v506_v4  ;;  %v525_v48 = vor.u32 %v524_v35, %v521_v28  ;;  %v534_v49 = vrot.slane %v532_v37, 4  ;;  %v318_v37 = vld [vmem:[%s3932_s7 + $0x8c] sm:$0x1] }
  0xae   : > { %3233 = vmatmul.mubr.msk.bf16.gmra.mrb[16].mxu0 %vm775_vm2, %v3479_v62  ;;  %v552_v50 = vshll.u32 %v4117_v31, 16  ;;  %v517_v51 = vsel %vm3977_vm3, %v512_v40, %v516_v26  ;;  %v540_v52 = vrot.slane %v538_v41, 5  ;;  %v545_v55 = vrot.slane %v543_v42, 4  ;;  %v4151_v26 = vld [vmem:[%s3932_s7 + $0x88] sm:$0xf] }
  0xaf   : > { %3236 = vmatprep.mubr.msk.bf16.mxu0 %vm775_vm2, %v3482_v8  ;;  %v548_v56 = vrot.slane %v546_v44, 5  ;;  %v2789_v59 = vcombine.low %v507_v45, %v517_v51  ;;  %v526_v60 = vrot.slane %v525_v48, 4  ;;  %v535_v61 = vor.u32 %v534_v49, %v530_v36  ;;  %v317_v8 = vld [vmem:[%s3932_s7 + $0x80] sm:$0x1]  ;;  %v3485_v49 = vld [vmem:[%s3932_s7 + $0xa8] sm:$0xff]  }
  0xb0   : > { %v554_v62 = vrot.slane %v552_v50, 5  ;;  %v556_v4 = vshrl.u32 %v4117_v31, 16  ;;  %v562_v5 = vshll.u32 %v316_v39, 16  ;;  %v567_v10 = vshrl.u32 %v4133_v1, 16 }
  0xb1   : > { %v549_v3 = vor.u32 %v548_v56, %v545_v55  ;;  %3157 = vmatmul.mubr.msk.bf16.gmra.mrb[12].mxu1 %vm775_vm2, %v2789_v59  ;;  %v531_v11 = vsel %vm3977_vm3, %v526_v60, %v530_v36  ;;  %v536_v12 = vrot.slane %v535_v61, 4  ;;  %v570_v13 = vshll.u32 %v4133_v1, 16  ;;  %v4167_v61 = vld [vmem:[%s3932_s7 + $0x90] sm:$0xf] }
  0xb2   : > { %v576_v16 = vshll.u32 %v4136_v2, 16  ;;  %v558_v20 = vrot.slane %v556_v4, 4  ;;  %v564_v21 = vrot.slane %v562_v5, 5  ;;  %v569_v24 = vrot.slane %v567_v10, 4  ;;  %v4173_v10 = vld [vmem:[%s3932_s7 + $0x94] sm:$0xf] }
  0xb3   : > { %v550_v19 = vrot.slane %v549_v3, 4  ;;  %v541_v28 = vsel %vm3977_vm3, %v536_v12, %v540_v52  ;;  %v572_v32 = vrot.slane %v570_v13, 5  ;;  %v580_v36 = vshrl.u32 %v4136_v2, 16 }
  0xb4   : > { %v578_v35 = vrot.slane %v576_v16, 5  ;;  %v2790_v39 = vcombine.low %v531_v11, %v541_v28  ;;  %v559_v41 = vor.u32 %v558_v20, %v554_v62  ;;  %v586_v42 = vshll.u32 %v317_v8, 16 }
  0xb5   : > { %v555_v40 = vsel %vm3977_vm3, %v550_v19, %v554_v62  ;;  %v573_v44 = vor.u32 %v572_v32, %v569_v24  ;;  %v591_v45 = vshrl.u32 %v4147_v17, 16  ;;  %v594_v48 = vshll.u32 %v4147_v17, 16  ;;  %v3486_v62 = vld [vmem:[%s3932_s7 + $0xb4] sm:$0xff]   ;;  %v4182_v32 = vld [vmem:[%s3932_s7 + $0x9c] sm:$0xf] }
  0xb6   : > { %3237 = vmatmul.mubr.msk.bf16.gmra.mrb[20].mxu0 %vm775_vm2, %v3483_v14  ;;  %v582_v14 = vrot.slane %v580_v36, 4  ;;  %3160 = vmatprep.mubr.msk.bf16.mxu1 %vm775_vm2, %v2790_v39  ;;  %v560_v50 = vrot.slane %v559_v41, 4  ;;  %v588_v51 = vrot.slane %v586_v42, 5  ;;  %v600_v52 = vshll.u32 %v4151_v26, 16  ;;  %v319_v19 = vld [vmem:[%s3932_s7 + $0x98] sm:$0x1] }
  0xb7   : > { %3240 = vmatprep.mubr.msk.bf16.mxu0 %vm775_vm2, %v3484_v58  ;;  %v604_v55 = vshrl.u32 %v4151_v26, 16  ;;  %v574_v56 = vrot.slane %v573_v44, 4  ;;  %v593_v59 = vrot.slane %v591_v45, 4  ;;  %v596_v60 = vrot.slane %v594_v48, 5  ;;  %v320_v45 = vld [vmem:[%s3932_s7 + $0xa4] sm:$0x1] }
  0xb8   : > { %v583_v58 = vor.u32 %v582_v14, %v578_v35  ;;  %v565_v3 = vsel %vm3977_vm3, %v560_v50, %v564_v21  ;;  %v602_v4 = vrot.slane %v600_v52, 5  ;;  %v610_v8 = vshll.u32 %v318_v37, 16  ;;  %v3487_v52 = vld [vmem:[%s3932_s7 + $0xc0] sm:$0xff]  }
  0xb9   : > { %v606_v5 = vrot.slane %v604_v55, 4  ;;  %v2791_v11 = vcombine.low %v555_v40, %v565_v3  ;;  %v579_v12 = vsel %vm3977_vm3, %v574_v56, %v578_v35  ;;  %v597_v16 = vor.u32 %v596_v60, %v593_v59  ;;  %v4190_v40 = vld [vmem:[%s3932_s7 + $0xa0] sm:$0xf] }
  0xba   : > { %v584_v13 = vrot.slane %v583_v58, 4  ;;  %v612_v24 = vrot.slane %v610_v8, 5  ;;  %v615_v21 = vshrl.u32 %v4167_v61, 16  ;;  %v618_v28 = vshll.u32 %v4167_v61, 16 }
  0xbb   : > { %v607_v20 = vor.u32 %v606_v5, %v602_v4  ;;  %3161 = vmatmul.mubr.msk.bf16.gmra.mrb[16].mxu1 %vm775_vm2, %v2791_v11  ;;  %v598_v36 = vrot.slane %v597_v16, 4  ;;  %v624_v37 = vshll.u32 %v4173_v10, 16  ;;  %v628_v39 = vshrl.u32 %v4173_v10, 16  ;;  %v4204_v5 = vld [vmem:[%s3932_s7 + $0xa8] sm:$0xf] }
  0xbc   : > { %v589_v35 = vsel %vm3977_vm3, %v584_v13, %v588_v51  ;;  %v617_v44 = vrot.slane %v615_v21, 4  ;;  %v620_v14 = vrot.slane %v618_v28, 5  ;;  %v634_v51 = vshll.u32 %v319_v19, 16  ;;  %v4208_v16 = vld [vmem:[%s3932_s7 + $0xac] sm:$0xf] }
  0xbd   : > { %v2792_v41 = vcombine.low %v579_v12, %v589_v35  ;;  %v608_v42 = vrot.slane %v607_v20, 4  ;;  %v603_v48 = vsel %vm3977_vm3, %v598_v36, %v602_v4  ;;  %v630_v50 = vrot.slane %v628_v39, 4 }
  0xbe   : > { %3241 = vmatmul.mubr.msk.bf16.gmra.mrb[24].mxu0 %vm775_vm2, %v3485_v49  ;;  %v626_v49 = vrot.slane %v624_v37, 5  ;;  %v621_v56 = vor.u32 %v620_v14, %v617_v44  ;;  %v639_v58 = vshrl.u32 %v4182_v32, 16  ;;  %v642_v59 = vshll.u32 %v4182_v32, 16  ;;  %v321_v37 = vld [vmem:[%s3932_s7 + $0xb0] sm:$0x1] }
  0xbf   : > { %3244 = vmatprep.mubr.msk.bf16.mxu0 %vm775_vm2, %v3486_v62  ;;  %3164 = vmatprep.mubr.msk.bf16.mxu1 %vm775_vm2, %v2792_v41  ;;  %v613_v55 = vsel %vm3977_vm3, %v608_v42, %v612_v24  ;;  %v636_v3 = vrot.slane %v634_v51, 5  ;;  %v648_v4 = vshll.u32 %v4190_v40, 16  ;;  %v652_v13 = vshrl.u32 %v4190_v40, 16  ;;  %v4217_v41 = vld [vmem:[%s3932_s7 + $0xb4] sm:$0xf] }
  0xc0   : > { %v2793_v60 = vcombine.low %v603_v48, %v613_v55  ;;  %v631_v62 = vor.u32 %v630_v50, %v626_v49  ;;  %v622_v8 = vrot.slane %v621_v56, 4  ;;  %v641_v11 = vrot.slane %v639_v58, 4 }
  0xc1   : > { %v644_v12 = vrot.slane %v642_v59, 5  ;;  %v650_v20 = vrot.slane %v648_v4, 5  ;;  %v658_v24 = vshll.u32 %v320_v45, 16  ;;  %v663_v21 = vshrl.u32 %v4204_v5, 16  ;;  %v322_v4 = vld [vmem:[%s3932_s7 + $0xbc] sm:$0x1] }
  0xc2   : > { %v632_v19 = vrot.slane %v631_v62, 4  ;;  %v627_v28 = vsel %vm3977_vm3, %v622_v8, %v626_v49  ;;  %v654_v36 = vrot.slane %v652_v13, 4  ;;  %v666_v39 = vshll.u32 %v4204_v5, 16 }
  0xc3   : > { %v645_v35 = vor.u32 %v644_v12, %v641_v11  ;;  %3165 = vmatmul.mubr.msk.bf16.gmra.mrb[20].mxu1 %vm775_vm2, %v2793_v60  ;;  %v660_v44 = vrot.slane %v658_v24, 5  ;;  %v665_v14 = vrot.slane %v663_v21, 4  ;;  %v672_v45 = vshll.u32 %v4208_v16, 16  ;;  %v2916_v24 = vld [vmem:[%s3932_s7 + $0xc] sm:$0xf] }
  0xc4   : > { %v637_v42 = vsel %vm3977_vm3, %v632_v19, %v636_v3  ;;  %v655_v50 = vor.u32 %v654_v36, %v650_v20  ;;  %v668_v51 = vrot.slane %v666_v39, 5  ;;  %v676_v56 = vshrl.u32 %v4208_v16, 16 }
  0xc5   : > { %v2794_v48 = vcombine.low %v627_v28, %v637_v42  ;;  %v646_v49 = vrot.slane %v645_v35, 4  ;;  %v674_v55 = vrot.slane %v672_v45, 5  ;;  %v682_v58 = vshll.u32 %v321_v37, 16 }
  0xc6   : > { %3245 = vmatmul.mubr.msk.bf16.gmra.mrb[28].mxu0 %vm775_vm2, %v3487_v52  ;;  %v4224_v52 = vld [vmem:[%s3932_s7 + $0xb8] sm:$0xf]  ;;  %v687_v59 = vshrl.u32 %v4217_v41, 16  ;;  %v656_v62 = vrot.slane %v655_v50, 4  ;;  %v669_v3 = vor.u32 %v668_v51, %v665_v14  ;;  %v690_v8 = vshll.u32 %v4217_v41, 16 }
  0xc7   : > { %3168 = vmatprep.mubr.msk.bf16.mxu1 %vm775_vm2, %v2794_v48  ;;  %v651_v60 = vsel %vm3977_vm3, %v646_v49, %v650_v20  ;;  %v678_v11 = vrot.slane %v676_v56, 4  ;;  %v684_v12 = vrot.slane %v682_v58, 5  ;;  %v696_v19 = vshll.u32 %v4224_v52, 16  ;;  %v2917_v20 = vld [vmem:[%s3932_s7 + $0x10] sm:$0xf] }
  0xc8   : > { %v689_v13 = vrot.slane %v687_v59, 4  ;;  %v661_v21 = vsel %vm3977_vm3, %v656_v62, %v660_v44  ;;  %v670_v28 = vrot.slane %v669_v3, 4  ;;  %v692_v35 = vrot.slane %v690_v8, 5  ;;  %v2918_v50 = vld [vmem:[%s3932_s7 + $0x14] sm:$0x1] }
  0xc9   : > { %v700_v36 = vshrl.u32 %v4224_v52, 16  ;;  %v2795_v37 = vcombine.low %v651_v60, %v661_v21  ;;  %v679_v39 = vor.u32 %v678_v11, %v674_v55  ;;  %v698_v42 = vrot.slane %v696_v19, 5  ;;  %v2920_v21 = vld [vmem:[%s3932_s7 + $0x1c] sm:$0xf] }
  0xca   : > { %v706_v14 = vshll.u32 %v322_v4, 16  ;;  %v675_v45 = vsel %vm3977_vm3, %v670_v28, %v674_v55  ;;  %v693_v48 = vor.u32 %v692_v35, %v689_v13  ;;  %v1706_v51 = vshrl.u32 %v2916_v24, 16  ;;  %v2919_v4 = vld [vmem:[%s3932_s7 + $0x18] sm:$0xf] }
  0xcb   : > { %v702_v49 = vrot.slane %v700_v36, 4  ;;  %3169 = vmatmul.mubr.msk.bf16.gmra.mrb[24].mxu1 %vm775_vm2, %v2795_v37  ;;  %v680_v44 = vrot.slane %v679_v39, 4  ;;  %v1709_v58 = vshll.u32 %v2916_v24, 16  ;;  %v1715_v59 = vshll.u32 %v2917_v20, 16 }
  0xcc   : > { %v708_v56 = vrot.slane %v706_v14, 5  ;;  %v694_v62 = vrot.slane %v693_v48, 4  ;;  %v1708_v3 = vrot.slane %v1706_v51, 4  ;;  %v1719_v8 = vshrl.u32 %v2917_v20, 16  ;;  %v2921_v14 = vld [vmem:[%s3932_s7 + $0x20] sm:$0x1] }
  0xcd   : > { %v703_v60 = vor.u32 %v702_v49, %v698_v42  ;;  %v685_v55 = vsel %vm3977_vm3, %v680_v44, %v684_v12  ;;  %v1711_v11 = vrot.slane %v1709_v58, 5  ;;  %v1717_v13 = vrot.slane %v1715_v59, 5  ;;  %v2922_v51 = vld [vmem:[%s3932_s7 + $0x24] sm:$0xf] }
  0xce   : > { %v1725_v19 = vshll.u32 %v2918_v50, 16  ;;  %v2796_v28 = vcombine.low %v675_v45, %v685_v55  ;;  %v699_v35 = vsel %vm3977_vm3, %v694_v62, %v698_v42  ;;  %v1721_v36 = vrot.slane %v1719_v8, 4  ;;  %v2923_v62 = vld [vmem:[%s3932_s7 + $0x28] sm:$0xf] }
  0xcf   : > { %v704_v24 = vrot.slane %v703_v60, 4  ;;  %v1712_v37 = vor.u32 %v1711_v11, %v1708_v3  ;;  %v1730_v20 = vshrl.u32 %v2919_v4, 16  ;;  %v1733_v48 = vshll.u32 %v2919_v4, 16  ;;  %v2924_v11 = vld [vmem:[%s3932_s7 + $0x2c] sm:$0x1] }
  0xd0   : > { %v1727_v39 = vrot.slane %v1725_v19, 5  ;;  %3172 = vmatprep.mubr.msk.bf16.mxu1 %vm775_vm2, %v2796_v28  ;;  %v1722_v49 = vor.u32 %v1721_v36, %v1717_v13  ;;  %v1739_v50 = vshll.u32 %v2920_v21, 16  ;;  %v1743_v45 = vshrl.u32 %v2920_v21, 16 }
  0xd1   : > { %v709_v12 = vsel %vm3977_vm3, %v704_v24, %v708_v56  ;;  %v1713_v42 = vrot.slane %v1712_v37, 4  ;;  %v1732_v58 = vrot.slane %v1730_v20, 4  ;;  %v1735_v59 = vrot.slane %v1733_v48, 5  ;;  %v2925_v37 = vld [vmem:[%s3932_s7 + $0x30] sm:$0xf] }
  0xd2   : > { %v2797_v44 = vcombine.low %v699_v35, %v709_v12  ;;  %v1723_v60 = vrot.slane %v1722_v49, 4  ;;  %v1741_v3 = vrot.slane %v1739_v50, 5  ;;  %v1745_v8 = vrot.slane %v1743_v45, 4  ;;  %v2926_v12 = vld [vmem:[%s3932_s7 + $0x34] sm:$0xf] }
  0xd3   : > { %v1749_v4 = vshll.u32 %v2921_v14, 16  ;;  %v1718_v56 = vsel %vm3977_vm3, %v1713_v42, %v1717_v13  ;;  %v1736_v55 = vor.u32 %v1735_v59, %v1732_v58  ;;  %v1754_v19 = vshrl.u32 %v2922_v51, 16 }
  0xd4   : > { %3173 = vmatmul.mubr.msk.bf16.gmra.mrb[28].mxu1 %vm775_vm2, %v2797_v44  ;;  %v1757_v21 = vshll.u32 %v2922_v51, 16  ;;  %v1728_v28 = vsel %vm3977_vm3, %v1723_v60, %v1727_v39  ;;  %v1746_v35 = vor.u32 %v1745_v8, %v1741_v3  ;;  %v1763_v36 = vshll.u32 %v2923_v62, 16  ;;  %v2927_v51 = vld [vmem:[%s3932_s7 + $0x38] sm:$0x1]  ;;  %v2928_v8 = vld [vmem:[%s3932_s7 + $0x3c] sm:$0xf] }
  0xd5   : > { %v1751_v24 = vrot.slane %v1749_v4, 5  ;;  %3180 = vmatprep.mubr.msk.bf16.mxu1 %vm775_vm2, %v2816_v15  ;;  %v2964_v14 = vcombine.low %v1718_v56, %v1728_v28  ;;  %v1737_v20 = vrot.slane %v1736_v55, 4  ;;  %v1756_v13 = vrot.slane %v1754_v19, 4  ;;  %v2929_v28 = vld [vmem:[%s3932_s7 + $0x40] sm:$0xf] }
  0xd6   : > { %v1759_v48 = vrot.slane %v1757_v21, 5  ;;  %v1747_v49 = vrot.slane %v1746_v35, 4  ;;  %v1765_v50 = vrot.slane %v1763_v36, 5  ;;  %v1767_v45 = vshrl.u32 %v2923_v62, 16 }
  0xd7   : > { %v1773_v39 = vshll.u32 %v2924_v11, 16  ;;  %3252 = vmatprep.mubr.msk.bf16.mxu0 %vm775_vm2, %v2964_v14  ;;  %v1742_v6 = vsel %vm3977_vm3, %v1737_v20, %v1741_v3  ;;  %v1778_v15 = vshrl.u32 %v2925_v37, 16  ;;  %v1781_v44 = vshll.u32 %v2925_v37, 16  ;;  %v2930_v37 = vld [vmem:[%s3932_s7 + $0x44] sm:$0x1] }
  0xd8   : > { %v1760_v7 = vor.u32 %v1759_v48, %v1756_v13  ;;  %v1752_v42 = vsel %vm3977_vm3, %v1747_v49, %v1751_v24  ;;  %v1769_v58 = vrot.slane %v1767_v45, 4  ;;  %v1787_v60 = vshll.u32 %v2926_v12, 16 }
  0xd9   : > { %v1775_v59 = vrot.slane %v1773_v39, 5  ;;  %v2965_v62 = vcombine.low %v1742_v6, %v1752_v42  ;;  %v1780_v56 = vrot.slane %v1778_v15, 4  ;;  %v1783_v55 = vrot.slane %v1781_v44, 5  ;;  %v2932_v6 = vld [vmem:[%s3932_s7 + $0x4c] sm:$0xf] }
  0xda   : > { %v1761_v4 = vrot.slane %v1760_v7, 4  ;;  %v1770_v11 = vor.u32 %v1769_v58, %v1765_v50  ;;  %v1789_v19 = vrot.slane %v1787_v60, 5  ;;  %v1791_v3 = vshrl.u32 %v2926_v12, 16  ;;  %v2933_v15 = vld [vmem:[%s3932_s7 + $0x50] sm:$0x1] }
  0xdb   : > { %v1797_v21 = vshll.u32 %v2927_v51, 16  ;;  %3253 = vmatmul.mubr.msk.bf16.vlgmr.msra.gmra.mrb[0].mxu0 %vm775_vm2, %v2965_v62  ;;  %v1784_v24 = vor.u32 %v1783_v55, %v1780_v56  ;;  %v2818_v36 = vcombine.low %v3993_v46, %v3996_v47  ;;  %v1802_v14 = vshrl.u32 %v2928_v8, 16 }
  0xdc   : > { %3181 = vmatmul.mubr.msk.bf16.vlgmr.msra.gmra.mrb[0].mxu1 %vm775_vm2, %v2817_v34  ;;  %v1766_v35 = vsel %vm3977_vm3, %v1761_v4, %v1765_v50  ;;  %v1771_v20 = vrot.slane %v1770_v11, 4  ;;  %v1793_v13 = vrot.slane %v1791_v3, 4  ;;  %v2819_v12 = vcombine.low %v4002_v53, %v4005_v54  ;;  %v2931_v50 = vld [vmem:[%s3932_s7 + $0x48] sm:$0xf]  ;;  %v2934_v3 = vld [vmem:[%s3932_s7 + $0x54] sm:$0xf] }
  0xdd   : > { %v1799_v48 = vrot.slane %v1797_v21, 5  ;;  %v1785_v22 = vrot.slane %v1784_v24, 4  ;;  %3184 = vmatprep.mubr.msk.bf16.mxu1 %vm775_vm2, %v2818_v36  ;;  %v1804_v23 = vrot.slane %v1802_v14, 4  ;;  %v1805_v34 = vshll.u32 %v2928_v8, 16  ;;  %v2935_v36 = vld [vmem:[%s3932_s7 + $0x58] sm:$0xf] }
  0xde   : > { %v1811_v49 = vshll.u32 %v2929_v28, 16  ;;  %v1776_v46 = vsel %vm3977_vm3, %v1771_v20, %v1775_v59  ;;  %v1794_v47 = vor.u32 %v1793_v13, %v1789_v19  ;;  %v1815_v45 = vshrl.u32 %v2929_v28, 16 }
  0xdf   : > { %v1821_v39 = vshll.u32 %v2930_v37, 16  ;;  %v2966_v7 = vcombine.low %v1766_v35, %v1776_v46  ;;  %v1790_v51 = vsel %vm3977_vm3, %v1785_v22, %v1789_v19  ;;  %v1807_v53 = vrot.slane %v1805_v34, 5  ;;  %v2937_v46 = vld [vmem:[%s3932_s7 + $0x60] sm:$0xf] }
  0xe0   : > { %v1813_v54 = vrot.slane %v1811_v49, 5  ;;  %v1795_v44 = vrot.slane %v1794_v47, 4  ;;  %v1817_v42 = vrot.slane %v1815_v45, 4  ;;  %v1826_v60 = vshrl.u32 %v2931_v50, 16 }
  0xe1   : > { %v1823_v58 = vrot.slane %v1821_v39, 5  ;;  %3256 = vmatprep.mubr.msk.bf16.mxu0 %vm775_vm2, %v2966_v7  ;;  %v1808_v59 = vor.u32 %v1807_v53, %v1804_v23  ;;  %v1829_v8 = vshll.u32 %v2931_v50, 16  ;;  %v1835_v62 = vshll.u32 %v2932_v6, 16  ;;  %v2936_v23 = vld [vmem:[%s3932_s7 + $0x5c] sm:$0x1] }
  0xe2   : > { %v1839_v4 = vshrl.u32 %v2932_v6, 16  ;;  %v1800_v56 = vsel %vm3977_vm3, %v1795_v44, %v1799_v48  ;;  %v1818_v55 = vor.u32 %v1817_v42, %v1813_v54  ;;  %v1828_v11 = vrot.slane %v1826_v60, 4  ;;  %v2938_v7 = vld [vmem:[%s3932_s7 + $0x64] sm:$0xf]  ;;  %v2939_v44 = vld [vmem:[%s3932_s7 + $0x68] sm:$0x1] }
  0xe3   : > { %v1845_v19 = vshll.u32 %v2933_v15, 16  ;;  %v2967_v21 = vcombine.low %v1790_v51, %v1800_v56  ;;  %v1809_v28 = vrot.slane %v1808_v59, 4  ;;  %v1831_v35 = vrot.slane %v1829_v8, 5 }
  0xe4   : > { %3185 = vmatmul.mubr.msk.bf16.gmra.mrb[4].mxu1 %vm775_vm2, %v2819_v12  ;;  %v1837_v24 = vrot.slane %v1835_v62, 5  ;;  %v1819_v37 = vrot.slane %v1818_v55, 4  ;;  %v1841_v14 = vrot.slane %v1839_v4, 4  ;;  %v2820_v13 = vcombine.low %v4024_v18, %v4028_v25 }
  0xe5   : > { %v1847_v20 = vrot.slane %v1845_v19, 5  ;;  %3257 = vmatmul.mubr.msk.bf16.gmra.mrb[4].mxu0 %vm775_vm2, %v2967_v21  ;;  %v1814_v48 = vsel %vm3977_vm3, %v1809_v28, %v1813_v54  ;;  %v1832_v22 = vor.u32 %v1831_v35, %v1828_v11  ;;  %v2821_v12 = vcombine.low %v4038_v38, %v4044_v43  ;;  %v2940_v19 = vld [vmem:[%s3932_s7 + $0x6c] sm:$0xf] }
  0xe6   : > { %v1850_v34 = vshrl.u32 %v2934_v3, 16  ;;  %v1824_v49 = vsel %vm3977_vm3, %v1819_v37, %v1823_v58  ;;  %v1842_v50 = vor.u32 %v1841_v14, %v1837_v24  ;;  %3188 = vmatprep.mubr.msk.bf16.mxu1 %vm775_vm2, %v2820_v13  ;;  %v1853_v18 = vshll.u32 %v2934_v3, 16 }
  0xe7   : > { %v1859_v25 = vshll.u32 %v2935_v36, 16  ;;  %v2968_v47 = vcombine.low %v1814_v48, %v1824_v49  ;;  %v1833_v45 = vrot.slane %v1832_v22, 4  ;;  %v1863_v6 = vshrl.u32 %v2935_v36, 16 }
  0xe8   : > { %v1852_v39 = vrot.slane %v1850_v34, 4  ;;  %v1843_v51 = vrot.slane %v1842_v50, 4  ;;  %v1855_v53 = vrot.slane %v1853_v18, 5  ;;  %v1869_v43 = vshll.u32 %v2936_v23, 16 }
  0xe9   : > { %v1861_v38 = vrot.slane %v1859_v25, 5  ;;  %3260 = vmatprep.mubr.msk.bf16.mxu0 %vm775_vm2, %v2968_v47  ;;  %v1838_v54 = vsel %vm3977_vm3, %v1833_v45, %v1837_v24  ;;  %v1865_v15 = vrot.slane %v1863_v6, 4  ;;  %v1874_v42 = vshrl.u32 %v2937_v46, 16  ;;  %v2941_v24 = vld [vmem:[%s3932_s7 + $0x70] sm:$0xf] }
  0xea   : > { %v1877_v58 = vshll.u32 %v2937_v46, 16  ;;  %v1848_v60 = vsel %vm3977_vm3, %v1843_v51, %v1847_v20  ;;  %v1856_v59 = vor.u32 %v1855_v53, %v1852_v39  ;;  %v1871_v8 = vrot.slane %v1869_v43, 5  ;;  %v2944_v46 = vld [vmem:[%s3932_s7 + $0x7c] sm:$0xf] }
  0xeb   : > { %v1883_v62 = vshll.u32 %v2938_v7, 16  ;;  %v2969_v4 = vcombine.low %v1838_v54, %v1848_v60  ;;  %v1866_v56 = vor.u32 %v1865_v15, %v1861_v38  ;;  %v1876_v55 = vrot.slane %v1874_v42, 4  ;;  %v2945_v15 = vld [vmem:[%s3932_s7 + $0x80] sm:$0x1] }
  0xec   : > { %3189 = vmatmul.mubr.msk.bf16.gmra.mrb[8].mxu1 %vm775_vm2, %v2821_v12  ;;  %v1879_v11 = vrot.slane %v1877_v58, 5  ;;  %v1857_v3 = vrot.slane %v1856_v59, 4  ;;  %v1887_v28 = vshrl.u32 %v2938_v7, 16  ;;  %v1893_v35 = vshll.u32 %v2939_v44, 16  ;;  %v2942_v12 = vld [vmem:[%s3932_s7 + $0x74] sm:$0x1] }
  0xed   : > { %v1885_v21 = vrot.slane %v1883_v62, 5  ;;  %3261 = vmatmul.mubr.msk.bf16.gmra.mrb[8].mxu0 %vm775_vm2, %v2969_v4  ;;  %v1867_v36 = vrot.slane %v1866_v56, 4  ;;  %v2822_v14 = vcombine.low %v4059_v0, %v4064_v9  ;;  %v2823_v20 = vcombine.low %v4074_v27, %v4079_v33  ;;  %v2943_v0 = vld [vmem:[%s3932_s7 + $0x78] sm:$0xf]  ;;  %v2946_v62 = vld [vmem:[%s3932_s7 + $0x84] sm:$0xf] }
  0xee   : > { %v1880_v37 = vor.u32 %v1879_v11, %v1876_v55  ;;  %v1862_v13 = vsel %vm3977_vm3, %v1857_v3, %v1861_v38  ;;  %v1889_v48 = vrot.slane %v1887_v28, 4  ;;  %v1895_v22 = vrot.slane %v1893_v35, 5  ;;  %v2947_v35 = vld [vmem:[%s3932_s7 + $0x88] sm:$0xf] }
  0xef   : > { %v1898_v23 = vshrl.u32 %v2940_v19, 16  ;;  %v1872_v34 = vsel %vm3977_vm3, %v1867_v36, %v1871_v8  ;;  %3192 = vmatprep.mubr.msk.bf16.mxu1 %vm775_vm2, %v2822_v14  ;;  %v1901_v50 = vshll.u32 %v2940_v19, 16  ;;  %v1907_v18 = vshll.u32 %v2941_v24, 16  ;;  %v2948_v14 = vld [vmem:[%s3932_s7 + $0x8c] sm:$0x1] }
  0xf0   : > { %v1881_v49 = vrot.slane %v1880_v37, 4  ;;  %v2970_v9 = vcombine.low %v1862_v13, %v1872_v34  ;;  %v1890_v25 = vor.u32 %v1889_v48, %v1885_v21  ;;  %v1911_v33 = vshrl.u32 %v2941_v24, 16 }
  0xf1   : > { %v1900_v27 = vrot.slane %v1898_v23, 4  ;;  %v1903_v45 = vrot.slane %v1901_v50, 5  ;;  %v1909_v39 = vrot.slane %v1907_v18, 5  ;;  %v1917_v6 = vshll.u32 %v2942_v12, 16 }
  0xf2   : > { %v1886_v47 = vsel %vm3977_vm3, %v1881_v49, %v1885_v21  ;;  %3264 = vmatprep.mubr.msk.bf16.mxu0 %vm775_vm2, %v2970_v9  ;;  %v1891_v7 = vrot.slane %v1890_v25, 4  ;;  %v1913_v51 = vrot.slane %v1911_v33, 4  ;;  %v1922_v53 = vshrl.u32 %v2943_v0, 16 }
  0xf3   : > { %v1925_v38 = vshll.u32 %v2943_v0, 16  ;;  %v1904_v43 = vor.u32 %v1903_v45, %v1900_v27  ;;  %v1919_v54 = vrot.slane %v1917_v6, 5  ;;  %v1931_v44 = vshll.u32 %v2944_v46, 16  ;;  %v2950_v0 = vld [vmem:[%s3932_s7 + $0x94] sm:$0xf] }
  0xf4   : > { %3193 = vmatmul.mubr.msk.bf16.gmra.mrb[12].mxu1 %vm775_vm2, %v2823_v20  ;;  %v1935_v42 = vshrl.u32 %v2944_v46, 16  ;;  %v1896_v58 = vsel %vm3977_vm3, %v1891_v7, %v1895_v22  ;;  %v1914_v60 = vor.u32 %v1913_v51, %v1909_v39  ;;  %v1924_v59 = vrot.slane %v1922_v53, 4  ;;  %v2951_v27 = vld [vmem:[%s3932_s7 + $0x98] sm:$0x1] }
  0xf5   : > { %v1927_v8 = vrot.slane %v1925_v38, 5  ;;  %v2971_v4 = vcombine.low %v1886_v47, %v1896_v58  ;;  %v1905_v56 = vrot.slane %v1904_v43, 4  ;;  %v1933_v55 = vrot.slane %v1931_v44, 5  ;;  %v2952_v43 = vld [vmem:[%s3932_s7 + $0x9c] sm:$0xf] }
  0xf6   : > { %v1937_v11 = vrot.slane %v1935_v42, 4  ;;  %v1915_v19 = vrot.slane %v1914_v60, 4  ;;  %v1941_v21 = vshll.u32 %v2945_v15, 16  ;;  %v2824_v28 = vcombine.low %v4093_v57, %v4100_v63  ;;  %v2949_v63 = vld [vmem:[%s3932_s7 + $0x90] sm:$0xf] }
  0xf7   : > { %v1928_v3 = vor.u32 %v1927_v8, %v1924_v59  ;;  %3265 = vmatmul.mubr.msk.bf16.gmra.mrb[12].mxu0 %vm775_vm2, %v2971_v4  ;;  %v1910_v24 = vsel %vm3977_vm3, %v1905_v56, %v1909_v39  ;;  %v2825_v37 = vcombine.low %v4114_v30, %v4117_v31  ;;  %v1946_v20 = vshrl.u32 %v2946_v62, 16  ;;  %v2953_v58 = vld [vmem:[%s3932_s7 + $0xa0] sm:$0xf]  ;;  %v2954_v4 = vld [vmem:[%s3932_s7 + $0xa4] sm:$0x1] }
  0xf8   : > { %v1938_v36 = vor.u32 %v1937_v11, %v1933_v55  ;;  %v1920_v13 = vsel %vm3977_vm3, %v1915_v19, %v1919_v54  ;;  %v1943_v22 = vrot.slane %v1941_v21, 5  ;;  %3196 = vmatprep.mubr.msk.bf16.mxu1 %vm775_vm2, %v2824_v28  ;;  %v1949_v57 = vshll.u32 %v2946_v62, 16  ;;  %v2955_v28 = vld [vmem:[%s3932_s7 + $0xa8] sm:$0xf] }
  0xf9   : > { %v1929_v48 = vrot.slane %v1928_v3, 4  ;;  %v2972_v12 = vcombine.low %v1910_v24, %v1920_v13  ;;  %v1948_v34 = vrot.slane %v1946_v20, 4  ;;  %v1955_v49 = vshll.u32 %v2947_v35, 16 }
  0xfa   : > { %v1939_v23 = vrot.slane %v1938_v36, 4  ;;  %v1951_v31 = vrot.slane %v1949_v57, 5  ;;  %v1959_v50 = vshrl.u32 %v2947_v35, 16  ;;  %v1965_v18 = vshll.u32 %v2948_v14, 16  ;;  %v2956_v36 = vld [vmem:[%s3932_s7 + $0xac] sm:$0xf] }
  0xfb   : > { %v1934_v30 = vsel %vm3977_vm3, %v1929_v48, %v1933_v55  ;;  %3268 = vmatprep.mubr.msk.bf16.mxu0 %vm775_vm2, %v2972_v12  ;;  %v1957_v25 = vrot.slane %v1955_v49, 5  ;;  %v1970_v33 = vshrl.u32 %v2949_v63, 16  ;;  %v1973_v46 = vshll.u32 %v2949_v63, 16  ;;  %v2957_v63 = vld [vmem:[%s3932_s7 + $0xb0] sm:$0x1] }
  0xfc   : > { %v1944_v9 = vsel %vm3977_vm3, %v1939_v23, %v1943_v22  ;;  %3197 = vmatmul.mubr.msk.bf16.gmra.mrb[16].mxu1 %vm775_vm2, %v2825_v37  ;;  %v1952_v45 = vor.u32 %v1951_v31, %v1948_v34  ;;  %v1961_v39 = vrot.slane %v1959_v50, 4  ;;  %v1967_v6 = vrot.slane %v1965_v18, 5 }
  0xfd   : > { %v2973_v47 = vcombine.low %v1934_v30, %v1944_v9  ;;  %v1972_v7 = vrot.slane %v1970_v33, 4  ;;  %v1975_v51 = vrot.slane %v1973_v46, 5  ;;  %v1979_v53 = vshll.u32 %v2950_v0, 16  ;;  %v2958_v9 = vld [vmem:[%s3932_s7 + $0xb4] sm:$0xf] }
  0xfe   : > { %v1983_v38 = vshrl.u32 %v2950_v0, 16  ;;  %v1953_v54 = vrot.slane %v1952_v45, 4  ;;  %v1962_v15 = vor.u32 %v1961_v39, %v1957_v25  ;;  %v1989_v44 = vshll.u32 %v2951_v27, 16 }
  0xff   : > { %v2826_v42 = vcombine.low %v4133_v1, %v4136_v2  ;;  %3269 = vmatmul.mubr.msk.bf16.gmra.mrb[16].mxu0 %vm775_vm2, %v2973_v47  ;;  %v1976_v60 = vor.u32 %v1975_v51, %v1972_v7  ;;  %v1981_v59 = vrot.slane %v1979_v53, 5  ;;  %v2827_v62 = vcombine.low %v4147_v17, %v4151_v26  ;;  %v2959_v47 = vld [vmem:[%s3932_s7 + $0xb8] sm:$0xf] }
 0x100   : > { %v1985_v8 = vrot.slane %v1983_v38, 4  ;;  %v1958_v56 = vsel %vm3977_vm3, %v1953_v54, %v1957_v25  ;;  %v1963_v55 = vrot.slane %v1962_v15, 4  ;;  %v1991_v11 = vrot.slane %v1989_v44, 5 }
 0x101   : > { %3200 = vmatprep.mubr.msk.bf16.mxu1 %vm775_vm2, %v2826_v42  ;;  %v1994_v1 = vshrl.u32 %v2952_v43, 16  ;;  %v1977_v2 = vrot.slane %v1976_v60, 4  ;;  %v1997_v3 = vshll.u32 %v2952_v43, 16  ;;  %v2003_v21 = vshll.u32 %v2953_v58, 16  ;;  %v2960_v43 = vld [vmem:[%s3932_s7 + $0xbc] sm:$0x1] }
 0x102   : > { %v1986_v19 = vor.u32 %v1985_v8, %v1981_v59  ;;  %v1968_v35 = vsel %vm3977_vm3, %v1963_v55, %v1967_v6  ;;  %v2007_v26 = vshrl.u32 %v2953_v58, 16  ;;  %v2013_v24 = vshll.u32 %v2954_v4, 16 }
 0x103   : > { %v1996_v17 = vrot.slane %v1994_v1, 4  ;;  %v2974_v37 = vcombine.low %v1958_v56, %v1968_v35  ;;  %v1982_v14 = vsel %vm3977_vm3, %v1977_v2, %v1981_v59  ;;  %v1999_v13 = vrot.slane %v1997_v3, 5  ;;  %v2962_v59 = vld [vmem:[%s3932_s7 + $0xc4] sm:$0xf]  ;;  %v2963_v1 = vld [vmem:[%s3932_s7 + $0xc8] sm:$0x1] }
 0x104   : > { %v1987_v20 = vrot.slane %v1986_v19, 4  ;;  %3201 = vmatmul.mubr.msk.bf16.gmra.mrb[20].mxu1 %vm775_vm2, %v2827_v62  ;;  %v2005_v48 = vrot.slane %v2003_v21, 5  ;;  %v2009_v22 = vrot.slane %v2007_v26, 4  ;;  %v2015_v57 = vrot.slane %v2013_v24, 5 }
 0x105   : > { %v2018_v12 = vshrl.u32 %v2955_v28, 16  ;;  %3272 = vmatprep.mubr.msk.bf16.mxu0 %vm775_vm2, %v2974_v37  ;;  %v2000_v34 = vor.u32 %v1999_v13, %v1996_v17  ;;  %v2021_v49 = vshll.u32 %v2955_v28, 16  ;;  %v2027_v30 = vshll.u32 %v2956_v36, 16 }
 0x106   : > { %v1992_v23 = vsel %vm3977_vm3, %v1987_v20, %v1991_v11  ;;  %v2010_v50 = vor.u32 %v2009_v22, %v2005_v48  ;;  %v2031_v0 = vshrl.u32 %v2956_v36, 16  ;;  %v2037_v46 = vshll.u32 %v2957_v63, 16 }
 0x107   : > { %v2975_v31 = vcombine.low %v1982_v14, %v1992_v23  ;;  %v2020_v18 = vrot.slane %v2018_v12, 4  ;;  %v2001_v25 = vrot.slane %v2000_v34, 4  ;;  %v2023_v27 = vrot.slane %v2021_v49, 5 }
 0x108   : > { %v2029_v33 = vrot.slane %v2027_v30, 5  ;;  %v2011_v45 = vrot.slane %v2010_v50, 4  ;;  %v2033_v39 = vrot.slane %v2031_v0, 4  ;;  %v2828_v6 = vcombine.low %v4167_v61, %v4173_v10  ;;  %v2961_v10 = vld [vmem:[%s3932_s7 + $0xc0] sm:$0xf] }
 0x109   : > { %3273 = vmatmul.mubr.msk.bf16.gmra.mrb[20].mxu0 %vm775_vm2, %v2975_v31  ;;  %v2829_v7 = vcombine.low %v4182_v32, %v4190_v40  ;;  %v2006_v51 = vsel %vm3977_vm3, %v2001_v25, %v2005_v48  ;;  %v2024_v53 = vor.u32 %v2023_v27, %v2020_v18  ;;  %v2039_v38 = vrot.slane %v2037_v46, 5  ;;  %v4426_v0 = vld [vmem:[#allocation7] ss:$0 sm:$0xff]  ;;  %v4428_v46 = vld [vmem:[#allocation8] ss:$0 sm:$0xff] }
 0x10a   : > { %v2042_v54 = vshrl.u32 %v2958_v9, 16  ;;  %v2016_v15 = vsel %vm3977_vm3, %v2011_v45, %v2015_v57  ;;  %v2034_v44 = vor.u32 %v2033_v39, %v2029_v33  ;;  %3204 = vmatprep.mubr.msk.bf16.mxu1 %vm775_vm2, %v2828_v6  ;;  %v2045_v42 = vshll.u32 %v2958_v9, 16 }
 0x10b   : > { %v2051_v61 = vshll.u32 %v2959_v47, 16  ;;  %v2976_v58 = vcombine.low %v2006_v51, %v2016_v15  ;;  %v2025_v32 = vrot.slane %v2024_v53, 4  ;;  %v2055_v60 = vshrl.u32 %v2959_v47, 16 }
 0x10c   : > { %3205 = vmatmul.mubr.msk.bf16.gmra.mrb[24].mxu1 %vm775_vm2, %v2829_v7  ;;  %v2044_v40 = vrot.slane %v2042_v54, 4  ;;  %v2035_v8 = vrot.slane %v2034_v44, 4  ;;  %v2047_v62 = vrot.slane %v2045_v42, 5  ;;  %v2061_v56 = vshll.u32 %v2960_v43, 16 }
 0x10d   : > { %v2053_v4 = vrot.slane %v2051_v61, 5  ;;  %3276 = vmatprep.mubr.msk.bf16.mxu0 %vm775_vm2, %v2976_v58  ;;  %v2030_v55 = vsel %vm3977_vm3, %v2025_v32, %v2029_v33  ;;  %v2057_v11 = vrot.slane %v2055_v60, 4  ;;  %v2066_v2 = vshrl.u32 %v2961_v10, 16 }
 0x10e   : > { %v2069_v19 = vshll.u32 %v2961_v10, 16  ;;  %v2040_v3 = vsel %vm3977_vm3, %v2035_v8, %v2039_v38  ;;  %v2048_v21 = vor.u32 %v2047_v62, %v2044_v40  ;;  %v2063_v28 = vrot.slane %v2061_v56, 5 }
 0x10f   : > { %v2075_v35 = vshll.u32 %v2962_v59, 16  ;;  %v2977_v17 = vcombine.low %v2030_v55, %v2040_v3  ;;  %v2058_v26 = vor.u32 %v2057_v11, %v2053_v4  ;;  %v2068_v24 = vrot.slane %v2066_v2, 4 }
 0x110   : > { %v2071_v36 = vrot.slane %v2069_v19, 5  ;;  %v2049_v37 = vrot.slane %v2048_v21, 4  ;;  %v2079_v20 = vshrl.u32 %v2962_v59, 16  ;;  %v2085_v13 = vshll.u32 %v2963_v1, 16 }
 0x111   : > { %v2077_v14 = vrot.slane %v2075_v35, 5  ;;  %3277 = vmatmul.mubr.msk.bf16.gmra.mrb[24].mxu0 %vm775_vm2, %v2977_v17  ;;  %v2059_v48 = vrot.slane %v2058_v26, 4  ;;  %v2830_v57 = vcombine.low %v4204_v5, %v4208_v16  ;;  %v2831_v63 = vcombine.low %v4217_v41, %v4224_v52 }
 0x112   : > { %v2072_v22 = vor.u32 %v2071_v36, %v2068_v24  ;;  %v2054_v12 = vsel %vm3977_vm3, %v2049_v37, %v2053_v4  ;;  %v2081_v23 = vrot.slane %v2079_v20, 4  ;;  %v2087_v50 = vrot.slane %v2085_v13, 5 }
 0x113   : > { %v2064_v34 = vsel %vm3977_vm3, %v2059_v48, %v2063_v28  ;;  %3208 = vmatprep.mubr.msk.bf16.mxu1 %vm775_vm2, %v2830_v57 }
 0x114   : > { %v2073_v49 = vrot.slane %v2072_v22, 4  ;;  %v2978_v30 = vcombine.low %v2054_v12, %v2064_v34  ;;  %v2082_v31 = vor.u32 %v2081_v23, %v2077_v14  ;;  %3209 = vmatmul.mubr.msk.bf16.gmra.mrb[28].mxu1 %vm775_vm2, %v2831_v63 }
 0x116   : > { %3280 = vmatprep.mubr.msk.bf16.mxu0 %vm775_vm2, %v2978_v30  ;;  %v2078_v5 = vsel %vm3977_vm3, %v2073_v49, %v2077_v14  ;;  %v2083_v16 = vrot.slane %v2082_v31, 4 }
 0x118   : > { %v2088_v41 = vsel %vm3977_vm3, %v2083_v16, %v2087_v50 }
 0x119   : > { %v2979_v52 = vcombine.low %v2078_v5, %v2088_v41 }
 0x11b   : > { %3281 = vmatmul.mubr.msk.bf16.gmra.mrb[28].mxu0 %vm775_vm2, %v2979_v52 }
 0x1ae   : > { %v3254_v18 = vpop.f32.mrb[0].mxu0 }
 0x1af   : > { %v3182_v9 = vpop.f32.mrb[0].mxu1  ;;  %v2236_v25 = vpop.f32.mrb[1].mxu0 }
 0x1b0   : > { %v3284_v27 = vadd.f32 %v3254_v18, %v3182_v9  ;;  %v1159_v33 = vpop.f32.mrb[1].mxu1  ;;  %v3255_v47 = vpop.f32.mrb[2].mxu0 }
 0x1b1   : > { %v3285_v45 = vadd.f32 %v2236_v25, %v1159_v33  ;;  %v3183_v39 = vpop.f32.mrb[2].mxu1  ;;  %v2239_v29 = vpop.f32.mrb[3].mxu0 }
 0x1b2   : > { %v2397_v6 = vmul.f32 %v3284_v27, %v4426_v0  ;;  %v3286_v7 = vadd.f32 %v3255_v47, %v3183_v39  ;;  %v1162_v51 = vpop.f32.mrb[3].mxu1 }
 0x1b3   : > { %v2395_v53 = vmul.f32 %v3285_v45, %v4426_v0  ;;  %v3287_v38 = vadd.f32 %v2239_v29, %v1162_v51 }
 0x1b4   : > { %v2429_v43 = vadd.f32 %v4428_v46, %v2397_v6  ;;  %v2398_v54 = vmul.f32 %v3286_v7, %v4426_v0 }
 0x1b5   : > { %v2427_v15 = vadd.f32 %v4428_v46, %v2395_v53  ;;  %v2396_v44 = vmul.f32 %v3287_v38, %v4426_v0 }
 0x1b6   : > { %v2461_v42 = vmax.f32 %v2429_v43, 0.0  ;;  %v2430_v61 = vadd.f32 %v4428_v46, %v2398_v54 }
 0x1b7   : > { %v2459_v10 = vmax.f32 %v2427_v15, 0.0  ;;  %v2428_v58 = vadd.f32 %v4428_v46, %v2396_v44  ;;  %v3186_v32 = vpop.f32.mrb[4].mxu1 }
 0x1b8   : > { %v3037_v40 = vpack.c.bf16 %v2461_v42, %v2461_v42  ;;  %v2462_v60 = vmax.f32 %v2430_v61, 0.0  ;;  %v1175_v59 = vpop.f32.mrb[5].mxu1  ;;  %v3258_v4 = vpop.f32.mrb[4].mxu0 }
 0x1b9   : > { %v3035_v8 = vpack.c.bf16 %v2459_v10, %v2459_v10  ;;  %v2460_v62 = vmax.f32 %v2428_v58, 0.0  ;;  %v3187_v56 = vpop.f32.mrb[6].mxu1  ;;  %v2252_v11 = vpop.f32.mrb[5].mxu0  ;;  %v3288_v1 = vadd.f32 %v3258_v4, %v3186_v32 }
 0x1ba   : > { %2622 = vst.msk [vmem:[%s4439_s23 + $0x8] sm:$0xf] %vm2619_vm4, %v3037_v40  ;;  %v3038_v55 = vpack.c.bf16 %v2462_v60, %v2462_v60  ;;  %v1178_v2 = vpop.f32.mrb[7].mxu1  ;;  %v3259_v3 = vpop.f32.mrb[6].mxu0  ;;  %v3289_v21 = vadd.f32 %v2252_v11, %v1175_v59 }
 0x1bb   : > { %2620 = vst.msk [vmem:[%s4439_s23] sm:$0xf] %vm2619_vm4, %v3035_v8  ;;  %v3036_v19 = vpack.c.bf16 %v2460_v62, %v2460_v62  ;;  %v2401_v28 = vmul.f32 %v3288_v1, %v4426_v0  ;;  %v2255_v35 = vpop.f32.mrb[7].mxu0  ;;  %v3290_v17 = vadd.f32 %v3259_v3, %v3187_v56 }
 0x1bc   : > { %2623 = vst.msk [vmem:[%s4439_s23 + $0xc] sm:$0xf] %vm2619_vm4, %v3038_v55  ;;  %v2399_v26 = vmul.f32 %v3289_v21, %v4426_v0  ;;  %v3291_v24 = vadd.f32 %v2255_v35, %v1178_v2 }
 0x1bd   : > { %2621 = vst.msk [vmem:[%s4439_s23 + $0x4] sm:$0xf] %vm2619_vm4, %v3036_v19  ;;  %v2433_v36 = vadd.f32 %v4428_v46, %v2401_v28  ;;  %v2402_v37 = vmul.f32 %v3290_v17, %v4426_v0 }
 0x1be   : > { %v2431_v14 = vadd.f32 %v4428_v46, %v2399_v26  ;;  %v2400_v20 = vmul.f32 %v3291_v24, %v4426_v0 }
 0x1bf   : > { %v3190_v13 = vpop.f32.mrb[8].mxu1  ;;  %v2465_v48 = vmax.f32 %v2433_v36, 0.0  ;;  %v2434_v22 = vadd.f32 %v4428_v46, %v2402_v37 }
 0x1c0   : > { %v1191_v57 = vpop.f32.mrb[9].mxu1  ;;  %v2463_v63 = vmax.f32 %v2431_v14, 0.0  ;;  %v2432_v12 = vadd.f32 %v4428_v46, %v2400_v20  ;;  %v3262_v23 = vpop.f32.mrb[8].mxu0 }
 0x1c1   : > { %v3191_v34 = vpop.f32.mrb[10].mxu1  ;;  %v3041_v49 = vpack.c.bf16 %v2465_v48, %v2465_v48  ;;  %v2466_v30 = vmax.f32 %v2434_v22, 0.0  ;;  %v2268_v31 = vpop.f32.mrb[9].mxu0  ;;  %v3292_v50 = vadd.f32 %v3262_v23, %v3190_v13 }
 0x1c2   : > { %v1194_v5 = vpop.f32.mrb[11].mxu1  ;;  %v3039_v16 = vpack.c.bf16 %v2463_v63, %v2463_v63  ;;  %v2464_v41 = vmax.f32 %v2432_v12, 0.0  ;;  %v3263_v52 = vpop.f32.mrb[10].mxu0  ;;  %v3293_v18 = vadd.f32 %v2268_v31, %v1191_v57 }
 0x1c3   : > { %2626 = vst.msk [vmem:[%s4439_s23 + $0x18] sm:$0xf] %vm2619_vm4, %v3041_v49  ;;  %v3042_v9 = vpack.c.bf16 %v2466_v30, %v2466_v30  ;;  %v2405_v25 = vmul.f32 %v3292_v50, %v4426_v0  ;;  %v2271_v27 = vpop.f32.mrb[11].mxu0  ;;  %v3294_v33 = vadd.f32 %v3263_v52, %v3191_v34 }
 0x1c4   : > { %2624 = vst.msk [vmem:[%s4439_s23 + $0x10] sm:$0xf] %vm2619_vm4, %v3039_v16  ;;  %v3040_v47 = vpack.c.bf16 %v2464_v41, %v2464_v41  ;;  %v2403_v45 = vmul.f32 %v3293_v18, %v4426_v0  ;;  %v3295_v39 = vadd.f32 %v2271_v27, %v1194_v5 }
 0x1c5   : > { %2627 = vst.msk [vmem:[%s4439_s23 + $0x1c] sm:$0xf] %vm2619_vm4, %v3042_v9  ;;  %v2437_v6 = vadd.f32 %v4428_v46, %v2405_v25  ;;  %v2406_v29 = vmul.f32 %v3294_v33, %v4426_v0 }
 0x1c6   : > { %2625 = vst.msk [vmem:[%s4439_s23 + $0x14] sm:$0xf] %vm2619_vm4, %v3040_v47  ;;  %v2435_v7 = vadd.f32 %v4428_v46, %v2403_v45  ;;  %v2404_v51 = vmul.f32 %v3295_v39, %v4426_v0 }
 0x1c7   : > { %v3194_v53 = vpop.f32.mrb[12].mxu1  ;;  %v2469_v38 = vmax.f32 %v2437_v6, 0.0  ;;  %v2438_v43 = vadd.f32 %v4428_v46, %v2406_v29 }
 0x1c8   : > { %v1207_v54 = vpop.f32.mrb[13].mxu1  ;;  %v2467_v15 = vmax.f32 %v2435_v7, 0.0  ;;  %v2436_v44 = vadd.f32 %v4428_v46, %v2404_v51 }
 0x1c9   : > { %v3195_v42 = vpop.f32.mrb[14].mxu1  ;;  %v3045_v61 = vpack.c.bf16 %v2469_v38, %v2469_v38  ;;  %v2470_v10 = vmax.f32 %v2438_v43, 0.0 }
 0x1ca   : > { %v1210_v58 = vpop.f32.mrb[15].mxu1  ;;  %v3043_v32 = vpack.c.bf16 %v2467_v15, %v2467_v15  ;;  %v2468_v40 = vmax.f32 %v2436_v44, 0.0  ;;  %v3266_v60 = vpop.f32.mrb[12].mxu0 }
 0x1cb   : > { %2630 = vst.msk [vmem:[%s4439_s23 + $0x28] sm:$0xf] %vm2619_vm4, %v3045_v61  ;;  %v3046_v59 = vpack.c.bf16 %v2470_v10, %v2470_v10  ;;  %v2284_v8 = vpop.f32.mrb[13].mxu0  ;;  %v3296_v62 = vadd.f32 %v3266_v60, %v3194_v53 }
 0x1cc   : > { %2628 = vst.msk [vmem:[%s4439_s23 + $0x20] sm:$0xf] %vm2619_vm4, %v3043_v32  ;;  %v3044_v4 = vpack.c.bf16 %v2468_v40, %v2468_v40  ;;  %v3267_v56 = vpop.f32.mrb[14].mxu0  ;;  %v3297_v55 = vadd.f32 %v2284_v8, %v1207_v54 }
 0x1cd   : > { %2631 = vst.msk [vmem:[%s4439_s23 + $0x2c] sm:$0xf] %vm2619_vm4, %v3046_v59  ;;  %v2409_v11 = vmul.f32 %v3296_v62, %v4426_v0  ;;  %v2287_v1 = vpop.f32.mrb[15].mxu0  ;;  %v3298_v2 = vadd.f32 %v3267_v56, %v3195_v42 }
 0x1ce   : > { %2629 = vst.msk [vmem:[%s4439_s23 + $0x24] sm:$0xf] %vm2619_vm4, %v3044_v4  ;;  %v2407_v19 = vmul.f32 %v3297_v55, %v4426_v0  ;;  %v3299_v3 = vadd.f32 %v2287_v1, %v1210_v58 }
 0x1cf   : > { %v3198_v21 = vpop.f32.mrb[16].mxu1  ;;  %v2441_v28 = vadd.f32 %v4428_v46, %v2409_v11  ;;  %v2410_v35 = vmul.f32 %v3298_v2, %v4426_v0 }
 0x1d0   : > { %v1223_v17 = vpop.f32.mrb[17].mxu1  ;;  %v2439_v26 = vadd.f32 %v4428_v46, %v2407_v19  ;;  %v2408_v24 = vmul.f32 %v3299_v3, %v4426_v0 }
 0x1d1   : > { %v3199_v36 = vpop.f32.mrb[18].mxu1  ;;  %v2473_v37 = vmax.f32 %v2441_v28, 0.0  ;;  %v2442_v14 = vadd.f32 %v4428_v46, %v2410_v35 }
 0x1d2   : > { %v1226_v20 = vpop.f32.mrb[19].mxu1  ;;  %v2471_v13 = vmax.f32 %v2439_v26, 0.0  ;;  %v2440_v48 = vadd.f32 %v4428_v46, %v2408_v24  ;;  %v3270_v22 = vpop.f32.mrb[16].mxu0 }
 0x1d3   : > { %v3049_v57 = vpack.c.bf16 %v2473_v37, %v2473_v37  ;;  %v2474_v63 = vmax.f32 %v2442_v14, 0.0  ;;  %v2300_v12 = vpop.f32.mrb[17].mxu0  ;;  %v3300_v23 = vadd.f32 %v3270_v22, %v3198_v21 }
 0x1d4   : > { %v3047_v34 = vpack.c.bf16 %v2471_v13, %v2471_v13  ;;  %v2472_v49 = vmax.f32 %v2440_v48, 0.0  ;;  %v3271_v30 = vpop.f32.mrb[18].mxu0  ;;  %v3301_v31 = vadd.f32 %v2300_v12, %v1223_v17 }
 0x1d5   : > { %2634 = vst.msk [vmem:[%s4439_s23 + $0x38] sm:$0xf] %vm2619_vm4, %v3049_v57  ;;  %v3050_v50 = vpack.c.bf16 %v2474_v63, %v2474_v63  ;;  %v2413_v5 = vmul.f32 %v3300_v23, %v4426_v0  ;;  %v2303_v16 = vpop.f32.mrb[19].mxu0  ;;  %v3302_v41 = vadd.f32 %v3271_v30, %v3199_v36 }
 0x1d6   : > { %2632 = vst.msk [vmem:[%s4439_s23 + $0x30] sm:$0xf] %vm2619_vm4, %v3047_v34  ;;  %v3048_v52 = vpack.c.bf16 %v2472_v49, %v2472_v49  ;;  %v2411_v18 = vmul.f32 %v3301_v31, %v4426_v0  ;;  %v3303_v9 = vadd.f32 %v2303_v16, %v1226_v20 }
 0x1d7   : > { %v3202_v25 = vpop.f32.mrb[20].mxu1  ;;  %2635 = vst.msk [vmem:[%s4439_s23 + $0x3c] sm:$0xf] %vm2619_vm4, %v3050_v50  ;;  %v2445_v27 = vadd.f32 %v4428_v46, %v2413_v5  ;;  %v2414_v33 = vmul.f32 %v3302_v41, %v4426_v0 }
 0x1d8   : > { %v1239_v47 = vpop.f32.mrb[21].mxu1  ;;  %2633 = vst.msk [vmem:[%s4439_s23 + $0x34] sm:$0xf] %vm2619_vm4, %v3048_v52  ;;  %v2443_v45 = vadd.f32 %v4428_v46, %v2411_v18  ;;  %v2412_v39 = vmul.f32 %v3303_v9, %v4426_v0 }
 0x1d9   : > { %v3203_v6 = vpop.f32.mrb[22].mxu1  ;;  %v2477_v29 = vmax.f32 %v2445_v27, 0.0  ;;  %v2446_v7 = vadd.f32 %v4428_v46, %v2414_v33 }
 0x1da   : > { %v1242_v51 = vpop.f32.mrb[23].mxu1  ;;  %v2475_v53 = vmax.f32 %v2443_v45, 0.0  ;;  %v2444_v38 = vadd.f32 %v4428_v46, %v2412_v39 }
 0x1db   : > { %v3053_v43 = vpack.c.bf16 %v2477_v29, %v2477_v29  ;;  %v2478_v54 = vmax.f32 %v2446_v7, 0.0 }
 0x1dc   : > { %v3274_v15 = vpop.f32.mrb[20].mxu0  ;;  %v3051_v44 = vpack.c.bf16 %v2475_v53, %v2475_v53  ;;  %v2476_v42 = vmax.f32 %v2444_v38, 0.0 }
 0x1dd   : > { %v2316_v61 = vpop.f32.mrb[21].mxu0  ;;  %v3304_v10 = vadd.f32 %v3274_v15, %v3202_v25  ;;  %2638 = vst.msk [vmem:[%s4439_s23 + $0x48] sm:$0xf] %vm2619_vm4, %v3053_v43  ;;  %v3054_v58 = vpack.c.bf16 %v2478_v54, %v2478_v54 }
 0x1de   : > { %v3275_v32 = vpop.f32.mrb[22].mxu0  ;;  %v3305_v40 = vadd.f32 %v2316_v61, %v1239_v47  ;;  %2636 = vst.msk [vmem:[%s4439_s23 + $0x40] sm:$0xf] %vm2619_vm4, %v3051_v44  ;;  %v3052_v60 = vpack.c.bf16 %v2476_v42, %v2476_v42 }
 0x1df   : > { %v2417_v59 = vmul.f32 %v3304_v10, %v4426_v0  ;;  %v2319_v8 = vpop.f32.mrb[23].mxu0  ;;  %v3306_v62 = vadd.f32 %v3275_v32, %v3203_v6  ;;  %v3206_v4 = vpop.f32.mrb[24].mxu1  ;;  %2639 = vst.msk [vmem:[%s4439_s23 + $0x4c] sm:$0xf] %vm2619_vm4, %v3054_v58 }
 0x1e0   : > { %v2415_v56 = vmul.f32 %v3305_v40, %v4426_v0  ;;  %v3307_v55 = vadd.f32 %v2319_v8, %v1242_v51  ;;  %v1255_v11 = vpop.f32.mrb[25].mxu1  ;;  %2637 = vst.msk [vmem:[%s4439_s23 + $0x44] sm:$0xf] %vm2619_vm4, %v3052_v60 }
 0x1e1   : > { %v2449_v1 = vadd.f32 %v4428_v46, %v2417_v59  ;;  %v2418_v2 = vmul.f32 %v3306_v62, %v4426_v0  ;;  %v3207_v19 = vpop.f32.mrb[26].mxu1 }
 0x1e2   : > { %v2447_v3 = vadd.f32 %v4428_v46, %v2415_v56  ;;  %v2416_v21 = vmul.f32 %v3307_v55, %v4426_v0  ;;  %v1258_v28 = vpop.f32.mrb[27].mxu1 }
 0x1e3   : > { %v2481_v35 = vmax.f32 %v2449_v1, 0.0  ;;  %v2450_v17 = vadd.f32 %v4428_v46, %v2418_v2 }
 0x1e4   : > { %v2479_v26 = vmax.f32 %v2447_v3, 0.0  ;;  %v2448_v24 = vadd.f32 %v4428_v46, %v2416_v21  ;;  %v3278_v14 = vpop.f32.mrb[24].mxu0 }
 0x1e5   : > { %v3057_v36 = vpack.c.bf16 %v2481_v35, %v2481_v35  ;;  %v2482_v37 = vmax.f32 %v2450_v17, 0.0  ;;  %v2332_v48 = vpop.f32.mrb[25].mxu0  ;;  %v3308_v22 = vadd.f32 %v3278_v14, %v3206_v4 }
 0x1e6   : > { %v3055_v20 = vpack.c.bf16 %v2479_v26, %v2479_v26  ;;  %v2480_v13 = vmax.f32 %v2448_v24, 0.0  ;;  %v3279_v63 = vpop.f32.mrb[26].mxu0  ;;  %v3309_v12 = vadd.f32 %v2332_v48, %v1255_v11 }
 0x1e7   : > { %2642 = vst.msk [vmem:[%s4439_s23 + $0x58] sm:$0xf] %vm2619_vm4, %v3057_v36  ;;  %v3058_v57 = vpack.c.bf16 %v2482_v37, %v2482_v37  ;;  %v2421_v34 = vmul.f32 %v3308_v22, %v4426_v0  ;;  %v2335_v49 = vpop.f32.mrb[27].mxu0  ;;  %v3310_v30 = vadd.f32 %v3279_v63, %v3207_v19  ;;  %v3210_v31 = vpop.f32.mrb[28].mxu1 }
 0x1e8   : > { %2640 = vst.msk [vmem:[%s4439_s23 + $0x50] sm:$0xf] %vm2619_vm4, %v3055_v20  ;;  %v3056_v23 = vpack.c.bf16 %v2480_v13, %v2480_v13  ;;  %v2419_v50 = vmul.f32 %v3309_v12, %v4426_v0  ;;  %v3311_v5 = vadd.f32 %v2335_v49, %v1258_v28  ;;  %v1271_v16 = vpop.f32.mrb[29].mxu1 }
 0x1e9   : > { %2643 = vst.msk [vmem:[%s4439_s23 + $0x5c] sm:$0xf] %vm2619_vm4, %v3058_v57  ;;  %v2453_v41 = vadd.f32 %v4428_v46, %v2421_v34  ;;  %v2422_v52 = vmul.f32 %v3310_v30, %v4426_v0  ;;  %v3211_v18 = vpop.f32.mrb[30].mxu1 }
 0x1ea   : > { %2641 = vst.msk [vmem:[%s4439_s23 + $0x54] sm:$0xf] %vm2619_vm4, %v3056_v23  ;;  %v2451_v9 = vadd.f32 %v4428_v46, %v2419_v50  ;;  %v2420_v25 = vmul.f32 %v3311_v5, %v4426_v0  ;;  %v1274_v27 = vpop.f32.mrb[31].mxu1 }
 0x1eb   : > { %v2485_v33 = vmax.f32 %v2453_v41, 0.0  ;;  %v2454_v47 = vadd.f32 %v4428_v46, %v2422_v52 }
 0x1ec   : > { %v2483_v45 = vmax.f32 %v2451_v9, 0.0  ;;  %v2452_v39 = vadd.f32 %v4428_v46, %v2420_v25 }
 0x1ed   : > { %v3061_v6 = vpack.c.bf16 %v2485_v33, %v2485_v33  ;;  %v2486_v29 = vmax.f32 %v2454_v47, 0.0 }
 0x1ee   : > { %v3059_v7 = vpack.c.bf16 %v2483_v45, %v2483_v45  ;;  %v2484_v51 = vmax.f32 %v2452_v39, 0.0  ;;  %v3282_v53 = vpop.f32.mrb[28].mxu0 }
 0x1ef   : > { %2646 = vst.msk [vmem:[%s4439_s23 + $0x68] sm:$0xf] %vm2619_vm4, %v3061_v6  ;;  %v3062_v38 = vpack.c.bf16 %v2486_v29, %v2486_v29  ;;  %v2348_v43 = vpop.f32.mrb[29].mxu0  ;;  %v3312_v54 = vadd.f32 %v3282_v53, %v3210_v31 }
 0x1f0   : > { %2644 = vst.msk [vmem:[%s4439_s23 + $0x60] sm:$0xf] %vm2619_vm4, %v3059_v7  ;;  %v3060_v15 = vpack.c.bf16 %v2484_v51, %v2484_v51  ;;  %v3283_v44 = vpop.f32.mrb[30].mxu0  ;;  %v3313_v42 = vadd.f32 %v2348_v43, %v1271_v16 }
 0x1f1   : > { %2647 = vst.msk [vmem:[%s4439_s23 + $0x6c] sm:$0xf] %vm2619_vm4, %v3062_v38  ;;  %v2425_v61 = vmul.f32 %v3312_v54, %v4426_v0  ;;  %v2351_v10 = vpop.f32.mrb[31].mxu0  ;;  %v3314_v58 = vadd.f32 %v3283_v44, %v3211_v18 }
 0x1f2   : > { %2645 = vst.msk [vmem:[%s4439_s23 + $0x64] sm:$0xf] %vm2619_vm4, %v3060_v15  ;;  %v2423_v32 = vmul.f32 %v3313_v42, %v4426_v0  ;;  %v3315_v40 = vadd.f32 %v2351_v10, %v1274_v27 }
 0x1f3   : > { %v2457_v60 = vadd.f32 %v4428_v46, %v2425_v61  ;;  %v2426_v59 = vmul.f32 %v3314_v58, %v4426_v0 }
 0x1f4   : > { %v2455_v8 = vadd.f32 %v4428_v46, %v2423_v32  ;;  %v2424_v62 = vmul.f32 %v3315_v40, %v4426_v0 }
 0x1f5   : > { %v2489_v4 = vmax.f32 %v2457_v60, 0.0  ;;  %v2458_v56 = vadd.f32 %v4428_v46, %v2426_v59 }
 0x1f6   : > { %v2487_v55 = vmax.f32 %v2455_v8, 0.0  ;;  %v2456_v11 = vadd.f32 %v4428_v46, %v2424_v62 }
 0x1f7   : > { %v3065_v1 = vpack.c.bf16 %v2489_v4, %v2489_v4  ;;  %v2490_v2 = vmax.f32 %v2458_v56, 0.0 }
 0x1f8   : > { %v3063_v19 = vpack.c.bf16 %v2487_v55, %v2487_v55  ;;  %v2488_v3 = vmax.f32 %v2456_v11, 0.0 }
 0x1f9   : > { %2650 = vst.msk [vmem:[%s4439_s23 + $0x78] sm:$0xf] %vm2619_vm4, %v3065_v1  ;;  %v3066_v21 = vpack.c.bf16 %v2490_v2, %v2490_v2 }
 0x1fa   : > { %2648 = vst.msk [vmem:[%s4439_s23 + $0x70] sm:$0xf] %vm2619_vm4, %v3063_v19  ;;  %v3064_v0 = vpack.c.bf16 %v2488_v3, %v2488_v3 }
 0x1fb   : > { %2651 = vst.msk [vmem:[%s4439_s23 + $0x7c] sm:$0xf] %vm2619_vm4, %v3066_v21 }
 0x1fc   : > { %2649 = vst.msk [vmem:[%s4439_s23 + $0x74] sm:$0xf] %vm2619_vm4, %v3064_v0 }
 0x1fd   : > { %3631 = shalt.err (!%p3628_p4)
}
 0x1fe   : > { %s3632_s11 = scalar_lea.hbm %s4560_s28, 2048  ;;  %s3636_s5 = scalar_lea.hbm %s4616_s4, 4096 }
 0x1ff   : > { %p3633_p9 = scmp.ne.s32.totalorder %s4560_s28, %s3632_s11  ;;  %p3637_p8 = scmp.lt.u32.totalorder %s4560_s28, %s4616_s4 }
 0x200   : > { %p3638_p13 = scmp.lt.u32.totalorder %s3636_s5, %s3632_s11  ;;  %p3640_p10 = scmp.lt.u32.totalorder %s3632_s11, %s4560_s28 }
 0x201   : > { %p3634_p0 = pnand %p3633_p9, %p3877_p5 }
 0x202   : > { %p3639_p6 = por %p3638_p13, %p3637_p8 }
 0x203   : > { %p3635_p11 = pneg %p3634_p0 }
 0x204   : > { %p3641_p3 = por %p3640_p10, %p3639_p6 }
 0x206   : > { %p3642_p7 = pnand %p3641_p3, %p3635_p11 }
 0x208   : > { %3645 = shalt.err (!%p3642_p7)
}
 0x209   : > { %s3701_s23 = smov 64   ;;  %s3702_s14 = smov 4  }
 0x20a   : > { %3397 = dma.vmem_to_hbm [thread:$0]  (%p3877_p5), %s4562_s20, 2048, %s4560_s28, %s2653_s19, %s3701_s23, %s3701_s23, %s3702_s14  }
 0x20b PF: > { %s2681_s6 = sand.u32 1, %s3680_s15   ;;  %p4636_p12 = scmp.ne.s32.totalorder %s4621_s22, 0 }
 0x20c   : > { %p4637_p1 = scmp.ge.s32.totalorder %s3692_s18, 2  ;;  %s2682_s9 = scalar_lea.sflag [#allocation4], %s2681_s6 }
 0x20e   : > { %p3414_p2 = pnand %p4637_p1, %p4636_p12 }
 0x210   : > { %3675 = dma.done.wait (!%p3414_p2), %s2682_s9, 2048  }
 0x211   : > { %3677 = vsyncadd (!%p3414_p2), %s2682_s9, 4294965248  ;;  %p19_p4 = scmp.ge.s32.totalorder %s3863_s10, 4   ;;  %s4638_s15 = smov %s3684_s16 }
 0x212   : > { %s4639_s16 = smov %s3688_s17  ;;  %s4640_s17 = smov %s3873_s24 }
 0x213   : > { %s4641_s18 = smov %s3863_s10  ;;  %21 = sbr.rel (!%p19_p4) target bundleno = 7 (0x7), region = 97 }
 0x21a   :  { %2687 = vsyncpa [#allocation3], 1 }
 0x21b   :  { %2689 = vsyncpa [#allocation3 + $0x1], 1 }
 0x21c   :  { %2690 = vsyncpa [#allocation6], 1 }
 0x21d   :  { %2691 = vsyncpa [#allocation9], 1 }
 0x21e   :  { %2692 = vsyncpa [#allocation4], 1 }
 0x21f   :  { %2694 = vsyncpa [#allocation4 + $0x1], 1 }

</bundles_post_ra>
